<compile_context>
chip_gen: v5e
topology: v5e:2x2
jax: 0.10.0
libtpu: 0.0.40
codegen_flags: <defaults>
</compile_context>

<pallas_src>
import functools

import numpy as np
import jax
import jax.numpy as jnp
from jax.experimental import pallas as pl
from jax.experimental.pallas import tpu as pltpu


# -----------------------------------------------------------------------------
# In-kernel activation helpers (only ops with solid Mosaic lowerings).
# -----------------------------------------------------------------------------
def _erf(x):
    # Abramowitz & Stegun 7.1.26, |err| < 1.5e-7 (matches torch exact-erf GELU
    # to well within the test tolerance).
    a1, a2, a3, a4, a5 = 0.254829592, -0.284496736, 1.421413741, -1.453152027, 1.061405429
    p = 0.3275911
    sgn = jnp.where(x >= 0.0, 1.0, -1.0)
    ax = jnp.abs(x)
    t = 1.0 / (1.0 + p * ax)
    poly = ((((a5 * t + a4) * t + a3) * t + a2) * t + a1) * t
    return sgn * (1.0 - poly * jnp.exp(-ax * ax))


def _gelu_exact(x):
    return 0.5 * x * (1.0 + _erf(x * 0.7071067811865476))


def _apply_act(y, act, neg_slope):
    if act == "gelu":
        return _gelu_exact(y)
    if act == "leaky_relu":
        return jnp.where(y >= 0.0, y, neg_slope * y)
    if act == "relu":
        return jnp.maximum(y, 0.0)
    if act == "tanh":
        return jnp.tanh(y)
    if act == "sigmoid":
        return 1.0 / (1.0 + jnp.exp(-y))
    return y


# -----------------------------------------------------------------------------
# Precomputed 0/1 selection matrices folding Upsample(nearest, sf) + zero pad
# + tap-k shift:  (X @ T_k)[c, n] == x_up_padded[c, n + k]  (zeros at borders).
# Built once per (L, sf, K) on the host; cached as a device bf16 constant.
# -----------------------------------------------------------------------------
@functools.lru_cache(maxsize=None)
def _upsample_im2col_selectors(L, sf, K):
    pad = K // 2
    lout = L * sf + 2 * pad - K + 1
    n = np.arange(lout)[None, :]          # output position
    i = np.arange(L)[:, None]             # original (un-upsampled) column
    T = np.zeros((K, L, lout), np.float32)
    for k in range(K):
        m = n + k - pad                   # position in the upsampled signal
        valid = (m >= 0) & (m < L * sf)
        src = np.where(valid, m // sf, -1)
        T[k] = (i == src).astype(np.float32)
    return jnp.asarray(T, dtype=jnp.bfloat16)


# -----------------------------------------------------------------------------
# Kernel 1 — GenAdapter.forward:  upsample+pad+Conv1d+bias+act, NCL in/out.
# -----------------------------------------------------------------------------
def _fwd_kernel(x_ref, t_ref, w_ref, b_ref, o_ref, *, ksize, act, neg_slope):
    xb = x_ref[0].astype(jnp.bfloat16)                       # (Cin, L) bf16
    # im2col^T built on the MXU: block k = X @ T_k (exact copies of x entries).
    cols = [jnp.dot(xb, t_ref[k], preferred_element_type=jnp.float32)
            .astype(jnp.bfloat16) for k in range(ksize)]
    xcol = jnp.concatenate(cols, axis=0)                     # (K*Cin, Lout) bf16
    acc = jnp.dot(w_ref[...], xcol,
                  preferred_element_type=jnp.float32)        # (Cout, Lout) f32
    y = _apply_act(acc + b_ref[...], act, neg_slope)         # bias + act in f32
    o_ref[0] = y.astype(o_ref.dtype)                         # lane-dense NCL store


def _forward_call(x, t_sel, w_flat, b_col, *, act, neg_slope=0.01):
    B, Cin, L = x.shape
    K, _, Lout = t_sel.shape
    Cout = w_flat.shape[0]
    kern = functools.partial(_fwd_kernel, ksize=K, act=act, neg_slope=neg_slope)
    flops = 2 * B * (K * Cin * L * Lout + Cout * K * Cin * Lout)
    transc = B * Cout * Lout if act in ("gelu", "tanh", "sigmoid") else 0
    bytes_acc = (x.size * 4 + t_sel.size * 2 + w_flat.size * 2 + b_col.size * 4
                 + B * Cout * Lout * 4)
    return pl.pallas_call(
        kern,
        out_shape=jax.ShapeDtypeStruct((B, Cout, Lout), jnp.float32),
        grid=(B,),
        in_specs=[
            pl.BlockSpec((1, Cin, L), lambda b: (b, 0, 0)),
            pl.BlockSpec((K, L, Lout), lambda b: (0, 0, 0)),
            pl.BlockSpec((Cout, K * Cin), lambda b: (0, 0)),
            pl.BlockSpec((Cout, 1), lambda b: (0, 0)),
        ],
        out_specs=pl.BlockSpec((1, Cout, Lout), lambda b: (b, 0, 0)),
        compiler_params=pltpu.CompilerParams(
            dimension_semantics=("parallel",),               # 1 batch row / TC on v7x
            vmem_limit_bytes=32 * 1024 * 1024,
        ),
        cost_estimate=pl.CostEstimate(flops=int(flops), transcendentals=int(transc),
                                      bytes_accessed=int(bytes_acc)),
    )(x, t_sel, w_flat, b_col)


# -----------------------------------------------------------------------------
# Kernel 2 — GenAdapter.forward_final, fully fused:
#   conv1 + act  ->  conv2(out_ch -> 1, zero pad via static shift fills) + tanh
# The intermediate activation never leaves the kernel; output is (B, 1, Lout),
# lane-dense.
# -----------------------------------------------------------------------------
def _final_kernel(x_ref, t_ref, w1_ref, b1_ref, w2_ref, b2_ref, o_ref,
                  *, k1, k2, act, neg_slope):
    xb = x_ref[0].astype(jnp.bfloat16)                       # (Cin, L) bf16
    cols = [jnp.dot(xb, t_ref[k], preferred_element_type=jnp.float32)
            .astype(jnp.bfloat16) for k in range(k1)]
    xcol = jnp.concatenate(cols, axis=0)                     # (K1*Cin, Lout)
    acc = jnp.dot(w1_ref[...], xcol,
                  preferred_element_type=jnp.float32)        # (Cout, Lout) f32
    y1 = _apply_act(acc + b1_ref[...], act, neg_slope)       # VMEM/vreg resident

    # conv2 (Cout -> 1): static lane shifts with zero fill (== conv2's zero
    # padding of the post-activation y1), per-channel VPU MACs, then one
    # cross-sublane reduction and tanh.
    cout, lout = y1.shape
    pad2 = k2 // 2
    w2 = w2_ref[...]                                         # (Cout, K2) f32, hoisted
    z = jnp.zeros_like(y1)
    for k in range(k2):
        s = k - pad2                                         # static python shift
        if s > 0:
            sh = jnp.concatenate([y1[:, s:], jnp.zeros((cout, s), jnp.float32)], axis=1)
        elif s < 0:
            sh = jnp.concatenate([jnp.zeros((cout, -s), jnp.float32), y1[:, :lout + s]], axis=1)
        else:
            sh = y1
        z = z + sh * w2[:, k:k + 1]
    out = jnp.tanh(jnp.sum(z, axis=0, keepdims=True) + b2_ref[0, 0])   # (1, Lout)
    o_ref[0] = out.astype(o_ref.dtype)                       # lane-dense store


def _forward_final_call(x, t_sel, w1_flat, b1_col, w2_col, b2_2d, *, act, neg_slope=0.01):
    B, Cin, L = x.shape
    K1, _, Lout = t_sel.shape
    Cout = w1_flat.shape[0]
    K2 = w2_col.shape[1]
    kern = functools.partial(_final_kernel, k1=K1, k2=K2, act=act, neg_slope=neg_slope)
    flops = 2 * B * (K1 * Cin * L * Lout + Cout * K1 * Cin * Lout
                     + K2 * Cout * Lout + Cout * Lout)
    transc = B * Lout * (Cout + 1)
    bytes_acc = (x.size * 4 + t_sel.size * 2 + w1_flat.size * 2 + b1_col.size * 4
                 + w2_col.size * 4 + 4 + B * Lout * 4)
    return pl.pallas_call(
        kern,
        out_shape=jax.ShapeDtypeStruct((B, 1, Lout), jnp.float32),
        grid=(B,),
        in_specs=[
            pl.BlockSpec((1, Cin, L), lambda b: (b, 0, 0)),
            pl.BlockSpec((K1, L, Lout), lambda b: (0, 0, 0)),
            pl.BlockSpec((Cout, K1 * Cin), lambda b: (0, 0)),
            pl.BlockSpec((Cout, 1), lambda b: (0, 0)),
            pl.BlockSpec((Cout, K2), lambda b: (0, 0)),
            pl.BlockSpec(memory_space=pltpu.MemorySpace.SMEM),   # (1,1) scalar b2
        ],
        out_specs=pl.BlockSpec((1, 1, Lout), lambda b: (b, 0, 0)),
        compiler_params=pltpu.CompilerParams(
            dimension_semantics=("parallel",),
            vmem_limit_bytes=32 * 1024 * 1024,
        ),
        cost_estimate=pl.CostEstimate(flops=int(flops), transcendentals=int(transc),
                                      bytes_accessed=int(bytes_acc)),
    )(x, t_sel, w1_flat, b1_col, w2_col, b2_2d)


# -----------------------------------------------------------------------------
# GenAdapter parameters + forward / forward_final wrappers (NCL in, NCL out —
# the kernels emit the module's layout directly; NO wrapper-side glue ops).
# -----------------------------------------------------------------------------
def init_gen_adapter(key, in_ch, out_ch, sf, kernel_size, act="gelu"):
    """act_fn constructor arg represented as a string: gelu/leaky_relu/relu/tanh."""
    k1, k2, k3, k4 = jax.random.split(key, 4)
    bound1 = 1.0 / (in_ch * kernel_size) ** 0.5
    w1 = jax.random.uniform(k1, (out_ch, in_ch, kernel_size), jnp.float32, -bound1, bound1)
    b1 = jax.random.uniform(k2, (out_ch,), jnp.float32, -bound1, bound1)
    bound2 = 1.0 / (out_ch * 5) ** 0.5
    w2 = jax.random.uniform(k3, (1, out_ch, 5), jnp.float32, -bound2, bound2)
    b2 = jax.random.uniform(k4, (1,), jnp.float32, -bound2, bound2)
    # Kernel-ready constants precomputed ONCE (no per-call transposes/casts):
    w1_flat = jnp.reshape(jnp.transpose(w1, (0, 2, 1)),
                          (out_ch, kernel_size * in_ch)).astype(jnp.bfloat16)
    b1_col = b1.reshape(out_ch, 1).astype(jnp.float32)
    w2_col = w2[0].astype(jnp.float32)                 # (out_ch, 5)
    b2_2d = b2.reshape(1, 1).astype(jnp.float32)
    return dict(w1=w1, b1=b1, w2=w2, b2=b2, sf=int(sf), kernel_size=int(kernel_size),
                act=act, w1_flat=w1_flat, b1_col=b1_col, w2_col=w2_col, b2_2d=b2_2d)


def gen_adapter_forward(params, x):
    """x: (B, in_ch, L) -> (B, out_ch, L*sf), mirroring GenAdapter.forward."""
    _, _, L = x.shape
    t_sel = _upsample_im2col_selectors(int(L), params["sf"], params["kernel_size"])
    return _forward_call(x, t_sel, params["w1_flat"], params["b1_col"], act=params["act"])


def gen_adapter_forward_final(params, x):
    """x: (B, in_ch, L) -> (B, 1, L*sf), mirroring GenAdapter.forward_final."""
    _, _, L = x.shape
    t_sel = _upsample_im2col_selectors(int(L), params["sf"], params["kernel_size"])
    return _forward_final_call(x, t_sel, params["w1_flat"], params["b1_col"],
                               params["w2_col"], params["b2_2d"], act=params["act"])


# -----------------------------------------------------------------------------
# Pure-JAX references (operands rounded to bf16 like the kernel's MXU path,
# math in f32) for correctness checking.
# -----------------------------------------------------------------------------
def _ref_conv1d_ncl(x, w, b, pad):
    B, Cin, L = x.shape
    Cout, _, K = w.shape
    xp = jnp.pad(x, ((0, 0), (0, 0), (pad, pad)))
    Lout = L + 2 * pad - K + 1
    idx = jnp.arange(Lout)[:, None] + jnp.arange(K)[None, :]
    patches = xp[:, :, idx]                          # (B, Cin, Lout, K)
    return jnp.einsum("bclk,ock->bol", patches, w) + b[None, :, None]


def _ref_act(y, act, neg_slope=0.01):
    if act == "gelu":
        return jax.nn.gelu(y, approximate=False)
    if act == "leaky_relu":
        return jnp.where(y >= 0.0, y, neg_slope * y)
    if act == "relu":
        return jnp.maximum(y, 0.0)
    if act == "tanh":
        return jnp.tanh(y)
    if act == "sigmoid":
        return jax.nn.sigmoid(y)
    return y


def ref_forward(params, x):
    K = params["kernel_size"]
    x_up = jnp.repeat(x, params["sf"], axis=2)
    xb = x_up.astype(jnp.bfloat16).astype(jnp.float32)
    wb = params["w1"].astype(jnp.bfloat16).astype(jnp.float32)
    return _ref_act(_ref_conv1d_ncl(xb, wb, params["b1"], K // 2), params["act"])


def ref_forward_final(params, x):
    y1 = ref_forward(params, x)
    return jnp.tanh(_ref_conv1d_ncl(y1, params["w2"], params["b2"], 2))


# -----------------------------------------------------------------------------
if __name__ == "__main__":
    key = jax.random.PRNGKey(0)
    kp, kx = jax.random.split(key)

    # Demo config: GenAdapter(in_ch=32, out_ch=128, sf=2, kernel_size=5,
    # act_fn=nn.GELU).  L=64 -> L*sf=128 so BOTH outputs are lane-dense and
    # out_ch=128 keeps the im2col matmul RHS/LHS lane-dense.
    IN_CH, OUT_CH, SF, KSIZE = 32, 128, 2, 5
    B, L = 2, 64

    params = init_gen_adapter(kp, IN_CH, OUT_CH, SF, KSIZE, act="gelu")
    x = jax.random.normal(kx, (B, IN_CH, L), jnp.float32)

    # forward (== up_layers)
    y = jax.block_until_ready(gen_adapter_forward(params, x))
    assert y.shape == (B, OUT_CH, L * SF), y.shape
    assert bool(jnp.all(jnp.isfinite(y))), "non-finite forward output"
    y_ref = ref_forward(params, x)
    assert bool(jnp.allclose(y, y_ref, atol=2e-3, rtol=2e-3)), (
        "forward mismatch, max abs err = %g" % float(jnp.max(jnp.abs(y - y_ref))))

    # forward_final (== interpreter(up_layers(x)))
    z = jax.block_until_ready(gen_adapter_forward_final(params, x))
    assert z.shape == (B, 1, L * SF), z.shape
    assert bool(jnp.all(jnp.isfinite(z))), "non-finite forward_final output"
    assert bool(jnp.all(jnp.abs(z) <= 1.0)), "tanh range violated"
    z_ref = ref_forward_final(params, x)
    assert bool(jnp.allclose(z, z_ref, atol=2e-3, rtol=2e-3)), (
        "forward_final mismatch, max abs err = %g" % float(jnp.max(jnp.abs(z - z_ref))))

    print("KERNEL_OK")
</pallas_src>

<mosaic_0001>
module attributes {stable_mosaic.version = 11 : i64} {
  func.func @_fwd_kernel(%arg0: i32, %arg1: memref<1x32x64xf32, #tpu.memory_space<vmem>>, %arg2: memref<5x64x128xbf16, #tpu.memory_space<vmem>>, %arg3: memref<128x160xbf16, #tpu.memory_space<vmem>>, %arg4: memref<128x1xf32, #tpu.memory_space<vmem>>, %arg5: memref<1x128x128xf32, #tpu.memory_space<vmem>>) attributes {dimension_semantics = [#tpu.dimension_semantics<parallel>], iteration_bounds = array<i64: 2>, scalar_prefetch = 0 : i64, scratch_operands = 0 : i64, tpu.core_type = #tpu.core_type<tc>, window_params = [{transform_indices = @transform_0, window_bounds = array<i64: 1, 32, 64>}, {pipeline_mode = #tpu.pipeline_mode<synchronous>, transform_indices = @transform_1, window_bounds = array<i64: 5, 64, 128>}, {pipeline_mode = #tpu.pipeline_mode<synchronous>, transform_indices = @transform_2, window_bounds = array<i64: 128, 160>}, {pipeline_mode = #tpu.pipeline_mode<synchronous>, transform_indices = @transform_3, window_bounds = array<i64: 128, 1>}, {transform_indices = @transform_4, window_bounds = array<i64: 1, 128, 128>}]} {
    %c0 = arith.constant 0 : index
    %c0_0 = arith.constant 0 : index
    %c0_1 = arith.constant 0 : index
    %0 = vector.load %arg1[%c0, %c0_0, %c0_1] : memref<1x32x64xf32, #tpu.memory_space<vmem>>, vector<1x32x64xf32>
    %1 = vector.shape_cast %0 : vector<1x32x64xf32> to vector<32x64xf32>
    %2 = arith.truncf %1 : vector<32x64xf32> to vector<32x64xbf16>
    %c0_2 = arith.constant 0 : index
    %c0_3 = arith.constant 0 : index
    %c0_4 = arith.constant 0 : index
    %3 = vector.load %arg2[%c0_2, %c0_3, %c0_4] : memref<5x64x128xbf16, #tpu.memory_space<vmem>>, vector<1x64x128xbf16>
    %4 = vector.shape_cast %3 : vector<1x64x128xbf16> to vector<64x128xbf16>
    %cst = arith.constant dense<0.000000e+00> : vector<32x128xf32>
    %5 = tpu.matmul %2, %4, %cst {dimension_numbers = #tpu.dot_dimension_numbers<[1], [0], [0], [1], [0, 0, 1, 1], [], []>} : vector<32x64xbf16>, vector<64x128xbf16>, vector<32x128xf32> -> vector<32x128xf32>
    %6 = arith.truncf %5 : vector<32x128xf32> to vector<32x128xbf16>
    %c1 = arith.constant 1 : index
    %c0_5 = arith.constant 0 : index
    %c0_6 = arith.constant 0 : index
    %7 = vector.load %arg2[%c1, %c0_5, %c0_6] : memref<5x64x128xbf16, #tpu.memory_space<vmem>>, vector<1x64x128xbf16>
    %8 = vector.shape_cast %7 : vector<1x64x128xbf16> to vector<64x128xbf16>
    %cst_7 = arith.constant dense<0.000000e+00> : vector<32x128xf32>
    %9 = tpu.matmul %2, %8, %cst_7 {dimension_numbers = #tpu.dot_dimension_numbers<[1], [0], [0], [1], [0, 0, 1, 1], [], []>} : vector<32x64xbf16>, vector<64x128xbf16>, vector<32x128xf32> -> vector<32x128xf32>
    %10 = arith.truncf %9 : vector<32x128xf32> to vector<32x128xbf16>
    %c2 = arith.constant 2 : index
    %c0_8 = arith.constant 0 : index
    %c0_9 = arith.constant 0 : index
    %11 = vector.load %arg2[%c2, %c0_8, %c0_9] : memref<5x64x128xbf16, #tpu.memory_space<vmem>>, vector<1x64x128xbf16>
    %12 = vector.shape_cast %11 : vector<1x64x128xbf16> to vector<64x128xbf16>
    %cst_10 = arith.constant dense<0.000000e+00> : vector<32x128xf32>
    %13 = tpu.matmul %2, %12, %cst_10 {dimension_numbers = #tpu.dot_dimension_numbers<[1], [0], [0], [1], [0, 0, 1, 1], [], []>} : vector<32x64xbf16>, vector<64x128xbf16>, vector<32x128xf32> -> vector<32x128xf32>
    %14 = arith.truncf %13 : vector<32x128xf32> to vector<32x128xbf16>
    %c3 = arith.constant 3 : index
    %c0_11 = arith.constant 0 : index
    %c0_12 = arith.constant 0 : index
    %15 = vector.load %arg2[%c3, %c0_11, %c0_12] : memref<5x64x128xbf16, #tpu.memory_space<vmem>>, vector<1x64x128xbf16>
    %16 = vector.shape_cast %15 : vector<1x64x128xbf16> to vector<64x128xbf16>
    %cst_13 = arith.constant dense<0.000000e+00> : vector<32x128xf32>
    %17 = tpu.matmul %2, %16, %cst_13 {dimension_numbers = #tpu.dot_dimension_numbers<[1], [0], [0], [1], [0, 0, 1, 1], [], []>} : vector<32x64xbf16>, vector<64x128xbf16>, vector<32x128xf32> -> vector<32x128xf32>
    %18 = arith.truncf %17 : vector<32x128xf32> to vector<32x128xbf16>
    %c4 = arith.constant 4 : index
    %c0_14 = arith.constant 0 : index
    %c0_15 = arith.constant 0 : index
    %19 = vector.load %arg2[%c4, %c0_14, %c0_15] : memref<5x64x128xbf16, #tpu.memory_space<vmem>>, vector<1x64x128xbf16>
    %20 = vector.shape_cast %19 : vector<1x64x128xbf16> to vector<64x128xbf16>
    %cst_16 = arith.constant dense<0.000000e+00> : vector<32x128xf32>
    %21 = tpu.matmul %2, %20, %cst_16 {dimension_numbers = #tpu.dot_dimension_numbers<[1], [0], [0], [1], [0, 0, 1, 1], [], []>} : vector<32x64xbf16>, vector<64x128xbf16>, vector<32x128xf32> -> vector<32x128xf32>
    %22 = arith.truncf %21 : vector<32x128xf32> to vector<32x128xbf16>
    %23 = tpu.concatenate %6, %10, %14, %18, %22 in 0 : vector<32x128xbf16>, vector<32x128xbf16>, vector<32x128xbf16>, vector<32x128xbf16>, vector<32x128xbf16> -> vector<160x128xbf16>
    %c0_17 = arith.constant 0 : index
    %c0_18 = arith.constant 0 : index
    %24 = vector.load %arg3[%c0_17, %c0_18] : memref<128x160xbf16, #tpu.memory_space<vmem>>, vector<128x160xbf16>
    %cst_19 = arith.constant dense<0.000000e+00> : vector<128x128xf32>
    %25 = tpu.matmul %24, %23, %cst_19 {dimension_numbers = #tpu.dot_dimension_numbers<[1], [0], [0], [1], [0, 0, 1, 1], [], []>} : vector<128x160xbf16>, vector<160x128xbf16>, vector<128x128xf32> -> vector<128x128xf32>
    %c0_20 = arith.constant 0 : index
    %c0_21 = arith.constant 0 : index
    %26 = vector.load %arg4[%c0_20, %c0_21] : memref<128x1xf32, #tpu.memory_space<vmem>>, vector<128x1xf32>
    %27 = vector.broadcast %26 : vector<128x1xf32> to vector<128x128xf32>
    %28 = arith.addf %25, %27 : vector<128x128xf32>
    %cst_22 = arith.constant 5.000000e-01 : f32
    %29 = vector.broadcast %cst_22 : f32 to vector<128x128xf32>
    %30 = arith.mulf %29, %28 : vector<128x128xf32>
    %cst_23 = arith.constant 0.707106769 : f32
    %31 = vector.broadcast %cst_23 : f32 to vector<128x128xf32>
    %32 = arith.mulf %28, %31 : vector<128x128xf32>
    %cst_24 = arith.constant 0.000000e+00 : f32
    %33 = vector.broadcast %cst_24 : f32 to vector<128x128xf32>
    %34 = arith.cmpf oge, %32, %33 : vector<128x128xf32>
    %cst_25 = arith.constant 1.000000e+00 : f32
    %cst_26 = arith.constant -1.000000e+00 : f32
    %35 = vector.broadcast %cst_25 : f32 to vector<128x128xf32>
    %36 = vector.broadcast %cst_26 : f32 to vector<128x128xf32>
    %37 = arith.select %34, %35, %36 : vector<128x128xi1>, vector<128x128xf32>
    %38 = math.absf %32 : vector<128x128xf32>
    %cst_27 = arith.constant 0.327591091 : f32
    %39 = vector.broadcast %cst_27 : f32 to vector<128x128xf32>
    %40 = arith.mulf %39, %38 : vector<128x128xf32>
    %cst_28 = arith.constant 1.000000e+00 : f32
    %41 = vector.broadcast %cst_28 : f32 to vector<128x128xf32>
    %42 = arith.addf %41, %40 : vector<128x128xf32>
    %cst_29 = arith.constant 1.000000e+00 : f32
    %43 = vector.broadcast %cst_29 : f32 to vector<128x128xf32>
    %44 = arith.divf %43, %42 : vector<128x128xf32>
    %cst_30 = arith.constant 1.06140542 : f32
    %45 = vector.broadcast %cst_30 : f32 to vector<128x128xf32>
    %46 = arith.mulf %45, %44 : vector<128x128xf32>
    %cst_31 = arith.constant -1.45315206 : f32
    %47 = vector.broadcast %cst_31 : f32 to vector<128x128xf32>
    %48 = arith.addf %46, %47 : vector<128x128xf32>
    %49 = arith.mulf %48, %44 : vector<128x128xf32>
    %cst_32 = arith.constant 1.42141378 : f32
    %50 = vector.broadcast %cst_32 : f32 to vector<128x128xf32>
    %51 = arith.addf %49, %50 : vector<128x128xf32>
    %52 = arith.mulf %51, %44 : vector<128x128xf32>
    %cst_33 = arith.constant -0.284496725 : f32
    %53 = vector.broadcast %cst_33 : f32 to vector<128x128xf32>
    %54 = arith.addf %52, %53 : vector<128x128xf32>
    %55 = arith.mulf %54, %44 : vector<128x128xf32>
    %cst_34 = arith.constant 0.254829586 : f32
    %56 = vector.broadcast %cst_34 : f32 to vector<128x128xf32>
    %57 = arith.addf %55, %56 : vector<128x128xf32>
    %58 = arith.mulf %57, %44 : vector<128x128xf32>
    %cst_35 = arith.constant 0.000000e+00 : f32
    %59 = vector.broadcast %cst_35 : f32 to vector<128x128xf32>
    %60 = arith.subf %59, %38 : vector<128x128xf32>
    %61 = arith.mulf %60, %38 : vector<128x128xf32>
    %62 = math.exp %61 : vector<128x128xf32>
    %63 = arith.mulf %58, %62 : vector<128x128xf32>
    %cst_36 = arith.constant 1.000000e+00 : f32
    %64 = vector.broadcast %cst_36 : f32 to vector<128x128xf32>
    %65 = arith.subf %64, %63 : vector<128x128xf32>
    %66 = arith.mulf %37, %65 : vector<128x128xf32>
    %cst_37 = arith.constant 1.000000e+00 : f32
    %67 = vector.broadcast %cst_37 : f32 to vector<128x128xf32>
    %68 = arith.addf %67, %66 : vector<128x128xf32>
    %69 = arith.mulf %30, %68 : vector<128x128xf32>
    %c0_38 = arith.constant 0 : index
    %c0_39 = arith.constant 0 : index
    %c0_40 = arith.constant 0 : index
    %70 = vector.load %arg5[%c0_38, %c0_39, %c0_40] : memref<1x128x128xf32, #tpu.memory_space<vmem>>, vector<1x128x128xf32>
    %71 = vector.shape_cast %70 : vector<1x128x128xf32> to vector<128x128xf32>
    %72 = vector.shape_cast %69 : vector<128x128xf32> to vector<1x128x128xf32>
    tpu.vector_store %arg5[%c0_38, %c0_39, %c0_40], %72 {strides = array<i32>} : memref<1x128x128xf32, #tpu.memory_space<vmem>>, vector<1x128x128xf32>,
    return
  }
  func.func @transform_0(%arg0: i32) -> (i32, i32, i32) {
    %c0_i32 = arith.constant 0 : i32
    %c0_i32_0 = arith.constant 0 : i32
    %c0_i32_1 = arith.constant 0 : i32
    return %arg0, %c0_i32, %c0_i32_0 : i32, i32, i32
  }
  func.func @transform_1(%arg0: i32) -> (i32, i32, i32) {
    %c0_i32 = arith.constant 0 : i32
    %c0_i32_0 = arith.constant 0 : i32
    %c0_i32_1 = arith.constant 0 : i32
    %c0_i32_2 = arith.constant 0 : i32
    return %c0_i32, %c0_i32_0, %c0_i32_1 : i32, i32, i32
  }
  func.func @transform_2(%arg0: i32) -> (i32, i32) {
    %c0_i32 = arith.constant 0 : i32
    %c0_i32_0 = arith.constant 0 : i32
    %c0_i32_1 = arith.constant 0 : i32
    return %c0_i32, %c0_i32_0 : i32, i32
  }
  func.func @transform_3(%arg0: i32) -> (i32, i32) {
    %c0_i32 = arith.constant 0 : i32
    %c0_i32_0 = arith.constant 0 : i32
    %c0_i32_1 = arith.constant 0 : i32
    return %c0_i32, %c0_i32_0 : i32, i32
  }
  func.func @transform_4(%arg0: i32) -> (i32, i32, i32) {
    %c0_i32 = arith.constant 0 : i32
    %c0_i32_0 = arith.constant 0 : i32
    %c0_i32_1 = arith.constant 0 : i32
    return %arg0, %c0_i32, %c0_i32_0 : i32, i32, i32
  }
}

</mosaic_0001>

<bundles_post_ra>
// kernel: tpu_custom_call.1
= control target key start
LH: loop header
LB: loop body
LE: loop exit
PB: predicated region body
PF: predicated region fallthrough
CT: control target
= control target key end

     0   :  { %9 = vsyncpa [#allocation3], 0  ;;  %s2902_s0 = inlined_call_operand.vmem [shape: f32[2,32,64], index: 0, kind: input, shape index: {}]   ;;  %s2903_s1 = inlined_call_operand.vmem [shape: bf16[5,64,128], index: 1, kind: input, shape index: {}]   ;;  %s2904_s2 = inlined_call_operand.vmem [shape: bf16[128,160], index: 2, kind: input, shape index: {}]   ;;  %s2905_s3 = inlined_call_operand.vmem [shape: f32[128,1], index: 3, kind: input, shape index: {}]   ;;  %s2906_s4 = inlined_call_operand.hbm [shape: f32[2,128,128], index: 4, kind: output, shape index: {}]  }
   0x1   :  { %11 = vsyncpa [#allocation3 + $0x1], 0  ;;  %s2051_s15 = smov 0   ;;  %s2053_s16 = smov 0  }
   0x2   :  { %s2055_s17 = smov 0   ;;  %s2057_s18 = smov 0  }
   0x3 LB: > { %s2072_s19 = sadd.s32 4294967295, %s2020_s18   ;;  %s1590_s20 = sadd.s32 4294967294, %s2020_s18   ;;  %s2020_s18 = sphi %s2057_s18, %s2926_s18   ;;  %s2016_s17 = sphi %s2055_s17, %s2925_s17   ;;  %s2012_s16 = sphi %s2053_s16, %s2924_s16   ;;  %s2008_s15 = sphi %s2051_s15, %s2923_s15  }
   0x4   : > { %s2076_s21 = sadd.s32 1, %s2020_s18   ;;  %s113_s22 = sadd.s32 1, %s2016_s17 }
   0x5   : > { %s110_s23 = ssub.s32 %s2020_s18, %s2076_s21  ;;  %p123_p0 = scmp.ne.s32.totalorder %s2016_s17, %s2012_s16 }
   0x6   : > { %p111_p1 = scmp.eq.s32.totalorder %s110_s23, 0  ;;  %p124_p2 = scmp.eq.s32.totalorder %s2072_s19, 1 }
   0x7   : > { %p129_p3 = scmp.ne.s32.totalorder %s2012_s16, %s2008_s15  ;;  %p130_p4 = scmp.eq.s32.totalorder %s1590_s20, 1 }
   0x8   : > { %s2087_s24 = scalar_select %p111_p1, %s2016_s17, %s113_s22  }
   0x9   : > { %p2089_p5 = por %p124_p2, %p123_p0  ;;  %p2093_p6 = por %p130_p4, %p129_p3 }
   0xa   : > { %p1593_p7 = scmp.ge.s32.totalorder %s2020_s18, 1  ;;  %p165_p8 = scmp.lt.s32.totalorder %s2020_s18, 3 }
   0xc   : > { %p166_p9 = pnand %p1593_p7, %p165_p8 }
   0xd   : > { %p191_p10 = scmp.lt.s32.totalorder (!%p166_p9), %s2072_s19, 1  ;;  %s188_s6 = sand.u32 (!%p166_p9), 1, %s2012_s16  }
   0xe   : > { %169 = sbr.rel (%p166_p9) target bundleno = 564 (0x234), region = 36  ;;  %s1833_s9 = sshll.u32 (!%p166_p9), %s2072_s19, 7 }
   0xf   : > { %s1524_s12 = scalar_lea.hbm (!%p166_p9), %s2906_s4, %s1833_s9  ;;  %s1978_s28 = scalar_lea.hbm (!%p166_p9), %s2906_s4, 256 }
  0x10   : > { %s1527_s14 = sshll.u32 (!%p166_p9), %s1524_s12, 4  ;;  %s1528_s14 = int_to_ptr.hbm [resolvable:$true] %s1527_s14 }
  0x11   : > { %s1972_s20 = sshra.s32 (!%p166_p9), %s1528_s14, 4  ;;  %s1973_s20 = int_to_ptr.hbm [resolvable:$true] %s1972_s20 }
  0x12   : > { %s1974_s22 = scalar_lea.hbm (!%p166_p9), %s1973_s20, 128  ;;  %p1979_p0 = scmp.lt.s32.totalorder (!%p166_p9), %s1973_s20, %s2906_s4 }
  0x13   : > { %v1800_v0 = vld [vmem:[%s2903_s1 + $0x18] sm:$0xff]  ;;  %v1799_v2 = vld [vmem:[%s2903_s1 + $0x10] sm:$0xff]  ;;  %s192_s7 = scalar_select %p191_p10, %s2072_s19, 1  ;;  %v1798_v5 = vld [vmem:[%s2903_s1 + $0x8] sm:$0xff]  ;;  %vm235_vm0 = vcmask 523264   ;;  %v2022_v53 = vmov 0  }
  0x14   : > { %v1808_v1 = vld [vmem:[%s2903_s1 + $0x58] sm:$0xff]  ;;  %246 = vmatpush.bf16.msra.mxu0 %v1800_v0  ;;  %1834 = vmatpush.bf16.msra.mxu3 %v1800_v0  ;;  %v1807_v3 = vld [vmem:[%s2903_s1 + $0x50] sm:$0xff]  ;;  %v1806_v6 = vld [vmem:[%s2903_s1 + $0x48] sm:$0xff]  ;;  %vm733_vm1 = vcmask 261120   ;;  %s1513_s19 = scalar_lea.sflag [#allocation3], %s188_s6  ;;  %p1975_p11 = scmp.ne.s32.totalorder %s1973_s20, %s1974_s22 }
  0x15   : > { %358 = vmatpush.bf16.msra.mxu2 %v1808_v1  ;;  %s1796_s10 = sshll.u32 %s192_s7, 5  ;;  %v1804_v4 = vld [vmem:[%s2903_s1 + $0x38] sm:$0xff]  ;;  %v1803_v7 = vld [vmem:[%s2903_s1 + $0x30] sm:$0xff]  ;;  %v1797_v8 = vld [vmem:[%s2903_s1] sm:$0xff]  ;;  %1892 = vset.pattern.permute.xlu1 %v2022_v53  ;;  %s1594_s7 = sshll.u32 %s188_s6, 7 }
  0x16   : > { %s195_s23 = scalar_lea.vmem %s2902_s0, %s1796_s10  ;;  %302 = vmatpush.bf16.msra.mxu1 %v1804_v4  ;;  %v1812_v13 = vld [vmem:[%s2903_s1 + $0x78] sm:$0xff]  ;;  %v1805_v15 = vld [vmem:[%s2903_s1 + $0x40] sm:$0xff]  ;;  %v1802_v16 = vld [vmem:[%s2903_s1 + $0x28] sm:$0xff]  ;;  %1891 = vset.pattern.permute.xlu0 %v2022_v53  ;;  %s2531_s8 = scalar_lea.vmem [#allocation2], %s1594_s7 }
  0x17   : > { %v197_v9 = vld [vmem:[%s195_s23] sm:$0xff]  ;;  %v198_v10 = vld [vmem:[%s195_s23 + $0x8] sm:$0xff]  ;;  %v199_v11 = vld [vmem:[%s195_s23 + $0x10] sm:$0xff]  ;;  %1893 = vset.pattern.permute.xlu2 %v2022_v53  ;;  %s1525_s13 = sshll.u32 %s2531_s8, 4  ;;  %p1976_p12 = pnand %p1975_p11, %p2089_p5  ;;  %s1526_s13 = int_to_ptr.vmem [resolvable:$true] %s1525_s13 }
  0x18   : > { %247 = vmatpush.bf16.msra.mxu0 %v1799_v2  ;;  %1835 = vmatpush.bf16.msra.mxu3 %v1799_v2  ;;  %v200_v12 = vld [vmem:[%s195_s23 + $0x18] sm:$0xff]  ;;  %v201_v17 = vpack.c.bf16 %v198_v10, %v197_v9  ;;  %v1811_v19 = vld [vmem:[%s2903_s1 + $0x70] sm:$0xff]  ;;  %v1801_v21 = vld [vmem:[%s2903_s1 + $0x20] sm:$0xff]  ;;  %p1980_p1 = scmp.lt.s32.totalorder %s1978_s28, %s1974_s22 }
  0x19   : > { %359 = vmatpush.bf16.msra.mxu2 %v1807_v3  ;;  %v1816_v14 = vld [vmem:[%s2903_s1 + $0x98] sm:$0xff]  ;;  %v202_v18 = vpack.c.bf16 %v200_v12, %v199_v11  ;;  %v1815_v20 = vld [vmem:[%s2903_s1 + $0x90] sm:$0xff]  ;;  %v1810_v22 = vld [vmem:[%s2903_s1 + $0x68] sm:$0xff]  ;;  %p1977_p13 = pneg %p1976_p12 }
  0x1a   : > { %303 = vmatpush.bf16.msra.mxu1 %v1803_v7  ;;  %v1814_v23 = vld [vmem:[%s2903_s1 + $0x88] sm:$0xff]  ;;  %v1809_v24 = vld [vmem:[%s2903_s1 + $0x60] sm:$0xff]  ;;  %v567_v52 = vld [vmem:[%s2905_s3 + $0x10] sm:$0xff]  ;;  %p1981_p2 = por %p1980_p1, %p1979_p0 }
  0x1b   : > { %v1813_v25 = vld [vmem:[%s2903_s1 + $0x80] sm:$0xff]  ;;  %593 = vperm.xlu1 %1892, %v567_v52   ;;  %v1823_v63 = vld [vmem:[%s2904_s2 + $0x34] sm:$0xf]  ;;  %v1747_v0 = vld [vmem:[%s2904_s2 + $0x38] sm:$0xf0] }
  0x1c   : > { %248 = vmatpush.bf16.msra.mxu0 %v1798_v5  ;;  %1836 = vmatpush.bf16.msra.mxu3 %v1798_v5  ;;  %v1817_v11 = vld [vmem:[%s2904_s2 + $0x4] sm:$0xf]  ;;  %v1723_v12 = vld [vmem:[%s2904_s2 + $0x8] sm:$0xf0]  ;;  %p1982_p3 = pnand %p1981_p2, %p1977_p13 }
  0x1d   : > { %360 = vmatpush.bf16.msra.mxu2 %v1806_v6  ;;  %v1750_v6 = vor.u32 %v1823_v63, %v1747_v0  ;;  %v1821_v0 = vld [vmem:[%s2904_s2 + $0x24] sm:$0xf] }
  0x1e   : > { %304 = vmatpush.bf16.msra.mxu1 %v1802_v16 }
  0x20   : > { %249 = vmatpush.bf16.msra.mxu0 %v1797_v8  ;;  %1837 = vmatpush.bf16.msra.mxu3 %v1797_v8 }
  0x21   : > { %361 = vmatpush.bf16.msra.mxu2 %v1805_v15  ;;  %v1726_v15 = vor.u32 %v1817_v11, %v1723_v12  ;;  %v1829_v11 = vld [vmem:[%s2904_s2 + $0x64] sm:$0xf]  ;;  %v1771_v12 = vld [vmem:[%s2904_s2 + $0x68] sm:$0xf0] }
  0x22   : > { %305 = vmatpush.bf16.msra.mxu1 %v1801_v21 }
  0x23   : > { %1613 = vmatmul.msk.bf16.vlgmr.msra.gmra.mxu0 %vm235_vm0, %v201_v17  ;;  %1614 = vmatmul.msk.bf16.vlgmr.msra.gmra.mxu3 %vm235_vm0, %v202_v18 }
  0x24   : > { %414 = vmatpush.bf16.msrb.mxu3 %v1812_v13  ;;  %470 = vmatpush.bf16.msrb.mxu0 %v1816_v14  ;;  %v568_v13 = vld [vmem:[%s2905_s3 + $0x18] sm:$0xff]  ;;  %v565_v14 = vld [vmem:[%s2905_s3] sm:$0xff] }
  0x25   : > { %1665 = vmatmul.msk.bf16.vlgmr.msra.gmra.mxu2 %vm235_vm0, %v201_v17  ;;  %1639 = vmatmul.msk.bf16.vlgmr.msra.gmra.mxu1 %vm235_vm0, %v201_v17 }
  0x26   : > { %598 = vperm.xlu1 %1892, %v568_v13   ;;  %583 = vperm.xlu0 %1891, %v565_v14  }
  0x28   : > { %415 = vmatpush.bf16.msrb.mxu3 %v1811_v19  ;;  %471 = vmatpush.bf16.msrb.mxu0 %v1815_v20 }
  0x2c   : > { %416 = vmatpush.bf16.msrb.mxu3 %v1810_v22  ;;  %472 = vmatpush.bf16.msrb.mxu0 %v1814_v23 }
  0x30   : > { %417 = vmatpush.bf16.msrb.mxu3 %v1809_v24  ;;  %473 = vmatpush.bf16.msrb.mxu0 %v1813_v25 }
  0x33   : > { %1691 = vmatmul.msk.bf16.vlgmr.msrb.gmra.mxu3 %vm235_vm0, %v201_v17  ;;  %1717 = vmatmul.msk.bf16.vlgmr.msrb.gmra.mxu0 %vm235_vm0, %v201_v17 }
  0x35   : > { %1666 = vmatmul.msk.bf16.gmra.mxu2 %vm235_vm0, %v202_v18  ;;  %1640 = vmatmul.msk.bf16.gmra.mxu1 %vm235_vm0, %v202_v18 }
  0x43   : > { %1692 = vmatmul.msk.bf16.gmra.mxu3 %vm235_vm0, %v202_v18  ;;  %1718 = vmatmul.msk.bf16.gmra.mxu0 %vm235_vm0, %v202_v18 }
  0xa0   : > { %v251_v26 = vpop.f32.mrf.mxu0 }
  0xa1   : > { %v261_v27 = vpack.c.bf16 %v251_v26, %v251_v26 }
  0xa2   : > { %v2182_v39 = vpop.f32.mrf.mxu1 }
  0xa3   : > { %v493_v30 = vunpack.c.l.b16 %v261_v27 }
  0xa6   : > { %v2174_v28 = vpop.f32.mrf.mxu3 }
  0xa8   : > { %v253_v29 = vpop.f32.mrf.mxu0  ;;  %v2180_v36 = vpop.f32.mrf.mxu2 }
  0xa9   : > { %v262_v31 = vpack.c.bf16 %v253_v29, %v253_v29  ;;  %v373_v17 = vpack.c.bf16 %v2180_v36, %v2180_v36  ;;  %v572_v29 = vld [vmem:[%s2905_s3 + $0x38] sm:$0xff] }
  0xaa   : > { %v2186_v43 = vpop.f32.mrf.mxu1  ;;  %618 = vperm.xlu1 %1892, %v572_v29   ;;  %v1824_v29 = vld [vmem:[%s2904_s2 + $0x34] sm:$0xf0] }
  0xab   : > { %v494_v32 = vunpack.c.l.b16 %v262_v31  ;;  %v517_v23 = vunpack.c.l.b16 %v373_v17  ;;  %v317_v31 = vpack.c.bf16 %v2182_v39, %v2182_v39  ;;  %v1737_v17 = vld [vmem:[%s2904_s2 + $0x20] sm:$0xf] }
  0xad   : > { %v2176_v33 = vpack.c.b16 %v494_v32, %v493_v30  ;;  %v566_v30 = vld [vmem:[%s2905_s3 + $0x8] sm:$0xff]  ;;  %v318_v32 = vpack.c.bf16 %v2186_v43, %v2186_v43 }
  0xae   : > { %v2178_v34 = vpop.f32.mrf.mxu3  ;;  %588 = vperm.xlu0 %1891, %v566_v30  }
  0xaf   : > { %v264_v39 = vpack.c.bf16 %v2178_v34, %v2178_v34  ;;  %v506_v43 = vunpack.c.l.b16 %v318_v32  ;;  %v1826_v32 = vld [vmem:[%s2904_s2 + $0x44] sm:$0xf0] }
  0xb0   : > { %v475_v35 = vpop.f32.mrf.mxu0  ;;  %v2184_v40 = vpop.f32.mrf.mxu2 }
  0xb1   : > { %v485_v47 = vpack.c.bf16 %v475_v35, %v475_v35  ;;  %v374_v18 = vpack.c.bf16 %v2184_v40, %v2184_v40  ;;  %v1755_v40 = vld [vmem:[%s2904_s2 + $0x48] sm:$0xf0] }
  0xb2   : > { %v312_v59 = vpop.f32.mrf.mxu1 }
  0xb3   : > { %v541_v55 = vunpack.c.l.b16 %v485_v47  ;;  %v518_v24 = vunpack.c.l.b16 %v374_v18  ;;  %v319_v25 = vpack.c.bf16 %v312_v59, %v312_v59  ;;  %v575_v47 = vld [vmem:[%s2905_s3 + $0x50] sm:$0xff]  ;;  %v1822_v18 = vld [vmem:[%s2904_s2 + $0x24] sm:$0xf0] }
  0xb4   : > { %633 = vperm.xlu1 %1892, %v575_v47   ;;  %v1827_v59 = vld [vmem:[%s2904_s2 + $0x54] sm:$0xf] }
  0xb5   : > { %v507_v35 = vunpack.c.l.b16 %v319_v25 }
  0xb6   : > { %v419_v37 = vpop.f32.mrf.mxu3 }
  0xb7   : > { %v429_v2 = vpack.c.bf16 %v419_v37, %v419_v37  ;;  %v521_v37 = vpack.c.b16 %v518_v24, %v517_v23  ;;  %v1738_v23 = vor.u32 %v1822_v18, %v1737_v17 }
  0xb8   : > { %v477_v38 = vpop.f32.mrf.mxu0  ;;  %v368_v45 = vpop.f32.mrf.mxu2 }
  0xb9   : > { %v486_v49 = vpack.c.bf16 %v477_v38, %v477_v38  ;;  %v375_v8 = vpack.c.bf16 %v368_v45, %v368_v45  ;;  %v529_v16 = vunpack.c.l.b16 %v429_v2  ;;  %v1825_v38 = vld [vmem:[%s2904_s2 + $0x44] sm:$0xf]  ;;  %v1819_v45 = vld [vmem:[%s2904_s2 + $0x14] sm:$0xf]  ;;  %v570_v2 = vld [vmem:[%s2905_s3 + $0x28] sm:$0xff] }
  0xba   : > { %v314_v22 = vpop.f32.mrf.mxu1 }
  0xbb   : > { %v542_v56 = vunpack.c.l.b16 %v486_v49  ;;  %v519_v19 = vunpack.c.l.b16 %v375_v8  ;;  %v320_v26 = vpack.c.bf16 %v314_v22, %v314_v22  ;;  %v263_v49 = vpack.c.bf16 %v2174_v28, %v2174_v28  ;;  %v1721_v28 = vld [vmem:[%s2904_s2] sm:$0xf]  ;;  %v1820_v8 = vld [vmem:[%s2904_s2 + $0x14] sm:$0xf0]  ;;  %v1779_v22 = vld [vmem:[%s2904_s2 + $0x78] sm:$0xf0] }
  0xbd   : > { %v545_v3 = vpack.c.b16 %v542_v56, %v541_v55  ;;  %v508_v36 = vunpack.c.l.b16 %v320_v26  ;;  %v495_v53 = vunpack.c.l.b16 %v263_v49  ;;  %v574_v55 = vld [vmem:[%s2905_s3 + $0x48] sm:$0xff]  ;;  %v579_v26 = vld [vmem:[%s2905_s3 + $0x70] sm:$0xff] }
  0xbe   : > { %v421_v41 = vpop.f32.mrf.mxu3  ;;  %v1818_v56 = vld [vmem:[%s2904_s2 + $0x4] sm:$0xf0] }
  0xbf   : > { %v430_v61 = vpack.c.bf16 %v421_v41, %v421_v41  ;;  %v1758_v41 = vor.u32 %v1825_v38, %v1755_v40 }
  0xc0   : > { %v480_v42 = vpop.f32.mrf.mxu0  ;;  %v370_v1 = vpop.f32.mrf.mxu2 }
  0xc1   : > { %v487_v44 = vpack.c.bf16 %v480_v42, %v480_v42  ;;  %v530_v7 = vunpack.c.l.b16 %v430_v61  ;;  %v376_v9 = vpack.c.bf16 %v370_v1, %v370_v1  ;;  %v505_v42 = vunpack.c.l.b16 %v317_v31  ;;  %v1739_v1 = vld [vmem:[%s2904_s2 + $0x28] sm:$0xf0]  ;;  %v1753_v31 = vld [vmem:[%s2904_s2 + $0x40] sm:$0xf] }
  0xc2   : > { %v1722_v61 = vor.u32 %v1818_v56, %v1721_v28 }
  0xc3   : > { %v543_v50 = vunpack.c.l.b16 %v487_v44  ;;  %v520_v20 = vunpack.c.l.b16 %v376_v9  ;;  %v533_v21 = vpack.c.b16 %v530_v7, %v529_v16  ;;  %v510_v44 = vpack.c.b16 %v508_v36, %v507_v35  ;;  %v580_v7 = vld [vmem:[%s2905_s3 + $0x78] sm:$0xff]  ;;  %v1769_v9 = vld [vmem:[%s2904_s2 + $0x60] sm:$0xf]  ;;  %v594_v36 = vpop.permute.xlu1 %593 }
  0xc4   : > { %v509_v52 = vpack.c.b16 %v506_v43, %v505_v42  ;;  %v576_v16 = vld [vmem:[%s2905_s3 + $0x58] sm:$0xff]  ;;  %v1754_v35 = vor.u32 %v1826_v32, %v1753_v31 }
  0xc5   : > { %v522_v27 = vpack.c.b16 %v520_v20, %v519_v19  ;;  %v1777_v19 = vld [vmem:[%s2904_s2 + $0x70] sm:$0xf]  ;;  %v1832_v20 = vld [vmem:[%s2904_s2 + $0x74] sm:$0xf0] }
  0xc6   : > { %v424_v46 = vpop.f32.mrf.mxu3  ;;  %v1778_v24 = vor.u32 %v1832_v20, %v1777_v19 }
  0xc7   : > { %v431_v57 = vpack.c.bf16 %v424_v46, %v424_v46  ;;  %v1731_v46 = vld [vmem:[%s2904_s2 + $0x18] sm:$0xf0] }
  0xc8   : > { %v482_v48 = vpop.f32.mrf.mxu0  ;;  %v1734_v34 = vor.u32 %v1819_v45, %v1731_v46 }
  0xc9   : > { %v488_v51 = vpack.c.bf16 %v482_v48, %v482_v48  ;;  %v531_v4 = vunpack.c.l.b16 %v431_v57  ;;  %v571_v48 = vld [vmem:[%s2905_s3 + $0x30] sm:$0xff] }
  0xca   : > { %613 = vperm.xlu0 %1891, %v571_v48   ;;  %v1761_v57 = vld [vmem:[%s2904_s2 + $0x50] sm:$0xf] }
  0xcb   : > { %v544_v54 = vunpack.c.l.b16 %v488_v51  ;;  %v496_v51 = vunpack.c.l.b16 %v264_v39  ;;  %v584_v39 = vpop.permute.xlu0 %583 }
  0xcd   : > { %v546_v58 = vpack.c.b16 %v544_v54, %v543_v50  ;;  %v569_v50 = vld [vmem:[%s2905_s3 + $0x20] sm:$0xff]  ;;  %v498_v54 = vpack.c.b16 %v496_v51, %v495_v53 }
  0xce   : > { %v426_v60 = vpop.f32.mrf.mxu3  ;;  %603 = vperm.xlu2 %1893, %v569_v50  }
  0xcf   : > { %v432_v62 = vpack.c.bf16 %v426_v60, %v426_v60  ;;  %813 = vmatpush.bf16.msra.mxu0 %v546_v58  ;;  %1846 = vmatpush.bf16.msrb.mxu2 %v546_v58  ;;  %v1828_v58 = vld [vmem:[%s2904_s2 + $0x54] sm:$0xf0]  ;;  %v1763_v60 = vld [vmem:[%s2904_s2 + $0x58] sm:$0xf0] }
  0xd0   : > { %v1766_v63 = vor.u32 %v1827_v59, %v1763_v60 }
  0xd1   : > { %v532_v5 = vunpack.c.l.b16 %v432_v62  ;;  %v1762_v62 = vor.u32 %v1828_v58, %v1761_v57 }
  0xd2   : > { %628 = vperm.xlu0 %1891, %v574_v55  }
  0xd3   : > { %814 = vmatpush.bf16.msra.mxu0 %v545_v3  ;;  %1847 = vmatpush.bf16.msrb.mxu2 %v545_v3  ;;  %v534_v10 = vpack.c.b16 %v532_v5, %v531_v4  ;;  %v577_v3 = vld [vmem:[%s2905_s3 + $0x60] sm:$0xff]  ;;  %v578_v4 = vld [vmem:[%s2905_s3 + $0x68] sm:$0xff] }
  0xd4   : > { %648 = vperm.xlu1 %1892, %v578_v4   ;;  %v573_v5 = vld [vmem:[%s2905_s3 + $0x40] sm:$0xff] }
  0xd5   : > { %758 = vmatpush.bf16.msrb.mxu1 %v534_v10  ;;  %1838 = vmatpush.bf16.msra.mxu3 %v534_v10  ;;  %v1830_v10 = vld [vmem:[%s2904_s2 + $0x64] sm:$0xf0] }
  0xd6   : > { %1786 = vmatmul.msk.bf16.vlgmr.msrb.gmra.mxu2 %vm733_vm1, %v1750_v6  ;;  %1783 = vmatmul.msk.bf16.vlgmr.msra.gmra.mxu0 %vm733_vm1, %v1726_v15  ;;  %v1729_v6 = vld [vmem:[%s2904_s2 + $0x10] sm:$0xf]  ;;  %v1770_v14 = vor.u32 %v1830_v10, %v1769_v9  ;;  %v1774_v15 = vor.u32 %v1829_v11, %v1771_v12 }
  0xd7   : > { %608 = vperm.xlu2 %1893, %v570_v2   ;;  %v1730_v13 = vor.u32 %v1820_v8, %v1729_v6 }
  0xd9   : > { %759 = vmatpush.bf16.msrb.mxu1 %v533_v21  ;;  %1839 = vmatpush.bf16.msra.mxu3 %v533_v21  ;;  %v1831_v21 = vld [vmem:[%s2904_s2 + $0x74] sm:$0xf] }
  0xda   : > { %643 = vperm.xlu0 %1891, %v577_v3   ;;  %v1782_v25 = vor.u32 %v1831_v21, %v1779_v22 }
  0xdd   : > { %760 = vmatpush.bf16.msrb.mxu1 %v522_v27  ;;  %1840 = vmatpush.bf16.msra.mxu3 %v522_v27  ;;  %v1745_v27 = vld [vmem:[%s2904_s2 + $0x30] sm:$0xf] }
  0xde   : > { %v1746_v30 = vor.u32 %v1824_v29, %v1745_v27 }
  0xdf   : > { %623 = vperm.xlu2 %1893, %v573_v5  }
  0xe1   : > { %761 = vmatpush.bf16.msrb.mxu1 %v521_v37  ;;  %1841 = vmatpush.bf16.msra.mxu3 %v521_v37 }
  0xe2   : > { %658 = vperm.xlu0 %1891, %v580_v7  }
  0xe5   : > { %762 = vmatpush.bf16.msrb.mxu1 %v510_v44  ;;  %1842 = vmatpush.bf16.msra.mxu3 %v510_v44 }
  0xe6   : > { %1787 = vmatmul.msk.bf16.gmra.mxu2 %vm733_vm1, %v1758_v41  ;;  %1784 = vmatmul.msk.bf16.gmra.mxu0 %vm733_vm1, %v1734_v34  ;;  %v2360_v41 = vpop.permute.xlu1 %598 }
  0xe7   : > { %638 = vperm.xlu2 %1893, %v576_v16  }
  0xe9   : > { %763 = vmatpush.bf16.msrb.mxu1 %v509_v52  ;;  %1843 = vmatpush.bf16.msra.mxu3 %v509_v52 }
  0xed   : > { %764 = vmatpush.bf16.msrb.mxu1 %v498_v54  ;;  %1844 = vmatpush.bf16.msra.mxu3 %v498_v54 }
  0xef   : > { %653 = vperm.xlu2 %1893, %v579_v26  }
  0xf1   : > { %765 = vmatpush.bf16.msrb.mxu1 %v2176_v33  ;;  %1845 = vmatpush.bf16.msra.mxu3 %v2176_v33  ;;  %v1742_v33 = vor.u32 %v1821_v0, %v1739_v1 }
  0xf4   : > { %766 = vmatmul.bf16.vlgmr.msrb.gmra.mxu1 %v1722_v61  ;;  %791 = vmatmul.bf16.vlgmr.msra.gmra.mxu3 %v1762_v62 }
  0xf6   : > { %1788 = vmatmul.msk.bf16.gmra.mxu2 %vm733_vm1, %v1766_v63  ;;  %1785 = vmatmul.msk.bf16.gmra.mxu0 %vm733_vm1, %v1742_v33 }
 0x104   : > { %771 = vmatmul.bf16.gmra.mxu1 %v1730_v13  ;;  %796 = vmatmul.bf16.gmra.mxu3 %v1770_v14 }
 0x106   : > { %1789 = vmatmul.msk.bf16.gmra.mxu2 %vm733_vm1, %v1774_v15 }
 0x114   : > { %776 = vmatmul.bf16.gmra.mxu1 %v1738_v23  ;;  %801 = vmatmul.bf16.gmra.mxu3 %v1778_v24 }
 0x116   : > { %1790 = vmatmul.msk.bf16.gmra.mxu2 %vm733_vm1, %v1782_v25 }
 0x11c   : > { %v2366_v44 = vpop.permute.xlu1 %618 }
 0x120   : > { %v589_v34 = vpop.permute.xlu0 %588 }
 0x124   : > { %781 = vmatmul.bf16.gmra.mxu1 %v1746_v30  ;;  %v2023_v30 = vmov -1.0  }
 0x126   : > { %v634_v51 = vpop.permute.xlu1 %633 }
 0x128   : > { %v2356_v38 = vpop.permute.xlu2 %603 }
 0x131   : > { %v2364_v43 = vpop.permute.xlu2 %608 }
 0x134   : > { %786 = vmatmul.bf16.gmra.mxu1 %v1754_v35 }
 0x139   : > { %v2370_v50 = vpop.permute.xlu2 %623 }
 0x13c   : > { %v2377_v63 = vpop.permute.xlu0 %613 }
 0x141   : > { %v639_v1 = vpop.permute.xlu2 %638 }
 0x144   : > { %v2390_v23 = vpop.permute.xlu0 %628 }
 0x153   : > { %v816_v45 = vpop.f32.mrf.mxu0 }
 0x159   : > { %v2354_v37 = vpop.f32.mrf.mxu2 }
 0x15b   : > { %v818_v60 = vpop.f32.mrf.mxu0 }
 0x161   : > { %v2358_v40 = vpop.f32.mrf.mxu2 }
 0x163   : > { %v821_v19 = vpop.f32.mrf.mxu0 }
 0x169   : > { %v2362_v42 = vpop.f32.mrf.mxu2 }
 0x171   : > { %v767_v46 = vpop.f32.mrf.mxu1  ;;  %v2368_v47 = vpop.f32.mrf.mxu2 }
 0x172   : > { %v768_v48 = vadd.f32 %v767_v46, %v584_v39 }
 0x174   : > { %v817_v49 = vadd.f32 %v816_v45, %v768_v48 }
 0x176   : > { %v872_v52 = vmul.f32 0.70710677, %v817_v49  ;;  %v2395_v25 = vmul.f32 0.5, %v817_v49 }
 0x177   : > { %v792_v53 = vpop.f32.mrf.mxu3 }
 0x178   : > { %v920_v54 = vand.u32 2147483647, %v872_v52  ;;  %v793_v28 = vadd.f32 %v792_v53, %v634_v51  ;;  %vm888_vm2 = vcmp.ge.f32.partialorder %v872_v52, 0.0 }
 0x179   : > { %v769_v55 = vpop.f32.mrf.mxu1  ;;  %v841_v56 = vpop.f32.mrf.mxu2  ;;  %v2402_v31 = vsel %vm888_vm2, 1.0, %v2023_v30 }
 0x17a   : > { %v936_v57 = vmul.f32 0.3275911, %v920_v54  ;;  %v770_v58 = vadd.f32 %v769_v55, %v589_v34  ;;  %v2372_v59 = vadd.f32 %v841_v56, %v793_v28  ;;  %v1352_v2 = vsub.f32 0.0, %v920_v54 }
 0x17c   : > { %v952_v61 = vadd.f32 1.0, %v936_v57  ;;  %v2375_v62 = vmul.f32 0.70710677, %v2372_v59  ;;  %v2379_v0 = vadd.f32 %v818_v60, %v770_v58  ;;  %v1368_v10 = vmul.f32 %v1352_v2, %v920_v54 }
 0x17e   : > { %1894 = vrcp.f32 %v952_v61  ;;  %v930_v3 = vand.u32 2147483647, %v2375_v62  ;;  %v2383_v4 = vmul.f32 0.70710677, %v2379_v0  ;;  %v977_v17 = vand.u32 2147483647, %v952_v61 }
 0x17f   : > { %v794_v33 = vpop.f32.mrf.mxu3  ;;  %v979_v21 = vand.u32 2147483648, %v952_v61  ;;  %v1384_v22 = vmul.f32 1.442695, %v1368_v10  ;;  %vm973_vm4 = vweird.f32 %v952_v61 }
 0x180   : > { %v946_v5 = vmul.f32 0.3275911, %v930_v3  ;;  %v795_v6 = vadd.f32 %v794_v33, %v639_v1  ;;  %v921_v8 = vand.u32 2147483647, %v2383_v4  ;;  %v1362_v26 = vsub.f32 0.0, %v930_v3 }
 0x181   : > { %v843_v7 = vpop.f32.mrf.mxu2  ;;  %v772_v9 = vpop.f32.mrf.mxu1  ;;  %vm2404_vm5 = vcmp.eq.f32.partialorder %v977_v17, 8.507059e+37  ;;  %v980_v45 = vor.u32 1.1754944e-38, %v979_v21 }
 0x182   : > { %v962_v11 = vadd.f32 1.0, %v946_v5  ;;  %v2386_v12 = vadd.f32 %v843_v7, %v795_v6  ;;  %v937_v14 = vmul.f32 0.3275911, %v921_v8  ;;  %v773_v16 = vadd.f32 %v772_v9, %v594_v36 }
 0x183   : > { %v1353_v46 = vsub.f32 0.0, %v921_v8  ;;  %v1378_v34 = vmul.f32 %v1362_v26, %v930_v3 }
 0x184   : > { %v1895_v13 = vpop.eup %1894  ;;  %1896 = vrcp.f32 %v962_v11  ;;  %v2388_v18 = vadd.f32 1.0, %v937_v14  ;;  %v2393_v24 = vmul.f32 0.70710677, %v2386_v12  ;;  %v2398_v29 = vadd.f32 %v821_v19, %v773_v16 }
 0x185   : > { %v969_v15 = vmul.f32 %v1895_v13, %v952_v61  ;;  %vm974_vm3 = vweird.f32 %v1895_v13  ;;  %vm1123_vm7 = vweird.f32 %v962_v11  ;;  %v1127_v52 = vand.u32 2147483647, %v962_v11 }
 0x186   : > { %1898 = vrcp.f32 %v2388_v18  ;;  %v931_v35 = vand.u32 2147483647, %v2393_v24  ;;  %vm975_vm6 = vmor %vm973_vm4, %vm974_vm3  ;;  %v1129_v53 = vand.u32 2147483648, %v962_v11  ;;  %v2410_v54 = vmul.f32 0.70710677, %v2398_v29 }
 0x187   : > { %v970_v20 = vsub.f32 1.0, %v969_v15  ;;  %1900 = vpow2.f32 %v1384_v22  ;;  %v992_v60 = vand.u32 2147483647, %v2388_v18  ;;  %v1369_v61 = vmul.f32 %v1353_v46, %v921_v8  ;;  %v797_v14 = vpop.f32.mrf.mxu3 }
 0x188   : > { %v947_v49 = vmul.f32 0.3275911, %v931_v35  ;;  %v2421_v1 = vand.u32 2147483647, %v2410_v54  ;;  %v1404_v3 = vmul.f32 1.442695, %v1378_v34  ;;  %vm988_vm11 = vweird.f32 %v2388_v18 }
 0x189   : > { %v971_v27 = vmul.f32 %v1895_v13, %v970_v20  ;;  %vm2432_vm10 = vcmp.eq.f32.partialorder %v1127_v52, 8.507059e+37  ;;  %v1130_v8 = vor.u32 1.1754944e-38, %v1129_v53  ;;  %v994_v10 = vand.u32 2147483648, %v2388_v18 }
 0x18a   : > { %v1897_v36 = vpop.eup %1896  ;;  %v2416_v56 = vadd.f32 1.0, %v947_v49  ;;  %v1363_v17 = vsub.f32 0.0, %v931_v35  ;;  %vm2439_vm12 = vcmp.eq.f32.partialorder %v992_v60, 8.507059e+37  ;;  %v1386_v20 = vmul.f32 1.442695, %v1369_v61 }
 0x18b   : > { %v972_v39 = vadd.f32 %v1895_v13, %v971_v27  ;;  %v1119_v48 = vmul.f32 %v1897_v36, %v962_v11  ;;  %vm1124_vm8 = vweird.f32 %v1897_v36  ;;  %v938_v21 = vmul.f32 0.3275911, %v2421_v1 }
 0x18c   : > { %v1899_v57 = vpop.eup %1898  ;;  %1902 = vrcp.f32 %v2416_v56  ;;  %vm2428_vm9 = vmor %vm1123_vm7, %vm1124_vm8  ;;  %vm1138_vm14 = vweird.f32 %v2416_v56  ;;  %v1379_v52 = vmul.f32 %v1363_v17, %v931_v35  ;;  %v1142_v61 = vand.u32 2147483647, %v2416_v56 }
 0x18d   : > { %v976_v51 = vsel %vm975_vm6, %v1895_v13, %v972_v39  ;;  %v1120_v55 = vsub.f32 1.0, %v1119_v48  ;;  %v984_v33 = vmul.f32 %v1899_v57, %v2388_v18  ;;  %v2425_v5 = vpop.eup %1900  ;;  %v644_v13 = vpop.permute.xlu0 %643  ;;  %vm989_vm13 = vweird.f32 %v1899_v57 }
 0x18e   : > { %v2414_v28 = vsel %vm2404_vm5, %v980_v45, %v976_v51  ;;  %v798_v27 = vadd.f32 %v797_v14, %v644_v13  ;;  %v995_v45 = vor.u32 1.1754944e-38, %v994_v10  ;;  %v2450_v46 = vadd.f32 1.0, %v938_v21  ;;  %v846_v48 = vpop.f32.mrf.mxu2  ;;  %vm990_vm15 = vmor %vm988_vm11, %vm989_vm13  ;;  %v774_v18 = vpop.f32.mrf.mxu1 }
 0x18f   : > { %v1208_v58 = vmul.f32 1.0614054, %v2414_v28  ;;  %v1121_v2 = vmul.f32 %v1897_v36, %v1120_v55  ;;  %v985_v16 = vsub.f32 1.0, %v984_v33  ;;  %v1144_v55 = vand.u32 2147483648, %v2416_v56 }
 0x190   : > { %1904 = vrcp.f32 %v2450_v46  ;;  %v775_v17 = vadd.f32 %v774_v18, %v2360_v41  ;;  %vm1143_vm2 = vcmp.eq.f32.partialorder %v1142_v61, 8.507059e+37  ;;  %vm898_vm3 = vcmp.ge.f32.partialorder %v2375_v62, 0.0 }
 0x191   : > { %v1224_v6 = vadd.f32 -1.4531521, %v1208_v58  ;;  %v1122_v15 = vadd.f32 %v1897_v36, %v1121_v2  ;;  %v986_v26 = vmul.f32 %v1899_v57, %v985_v16  ;;  %v2461_v2 = vadd.f32 %v846_v48, %v798_v27 }
 0x192   : > { %v1903_v34 = vpop.eup %1902  ;;  %1906 = vpow2.f32 %v1404_v3  ;;  %v1145_v13 = vor.u32 1.1754944e-38, %v1144_v55  ;;  %vm889_vm4 = vcmp.ge.f32.partialorder %v2383_v4, 0.0  ;;  %v823_v55 = vpop.f32.mrf.mxu0  ;;  %vm1003_vm6 = vweird.f32 %v2450_v46 }
 0x193   : > { %v1240_v11 = vmul.f32 %v1224_v6, %v2414_v28  ;;  %v1126_v22 = vsel %vm2428_vm9, %v1897_v36, %v1122_v15  ;;  %v987_v51 = vadd.f32 %v1899_v57, %v986_v26  ;;  %v1134_v53 = vmul.f32 %v1903_v34, %v2416_v56 }
 0x194   : > { %v2448_v39 = vsel %vm2432_vm10, %v1130_v8, %v1126_v22  ;;  %vm1139_vm0 = vweird.f32 %v1903_v34  ;;  %v1354_v8 = vsub.f32 0.0, %v2421_v1  ;;  %1908 = vpow2.f32 %v1386_v20 }
 0x195   : > { %v1256_v32 = vadd.f32 1.4214138, %v1240_v11  ;;  %v1218_v49 = vmul.f32 1.0614054, %v2448_v39  ;;  %v991_v60 = vsel %vm990_vm15, %v1899_v57, %v987_v51  ;;  %v1135_v6 = vsub.f32 1.0, %v1134_v53  ;;  %vm2473_vm1 = vmor %vm1138_vm14, %vm1139_vm0 }
 0x196   : > { %v2465_v35 = vsel %vm2439_vm12, %v995_v45, %v991_v60  ;;  %v2479_v3 = vmul.f32 0.70710677, %v2461_v2  ;;  %v1905_v11 = vpop.eup %1904  ;;  %v1406_v20 = vmul.f32 1.442695, %v1379_v52  ;;  %v1370_v41 = vmul.f32 %v1354_v8, %v2421_v1 }
 0x197   : > { %v1272_v36 = vmul.f32 %v1256_v32, %v2414_v28  ;;  %v1234_v58 = vadd.f32 -1.4531521, %v1218_v49  ;;  %v1209_v9 = vmul.f32 1.0614054, %v2465_v35  ;;  %v1136_v10 = vmul.f32 %v1903_v34, %v1135_v6 }
 0x198   : > { %v999_v26 = vmul.f32 %v1905_v11, %v2450_v46  ;;  %v1007_v45 = vand.u32 2147483647, %v2450_v46  ;;  %v2492_v48 = vand.u32 2147483647, %v2479_v3  ;;  %v1907_v49 = vpop.eup %1906  ;;  %vm1004_vm5 = vweird.f32 %v1905_v11 }
 0x199   : > { %v1288_v33 = vadd.f32 -0.28449672, %v1272_v36  ;;  %v1250_v7 = vmul.f32 %v1234_v58, %v2448_v39  ;;  %v1225_v15 = vadd.f32 -1.4531521, %v1209_v9  ;;  %v1137_v21 = vadd.f32 %v1903_v34, %v1136_v10  ;;  %vm1005_vm7 = vmor %vm1003_vm6, %vm1004_vm5 }
 0x19a   : > { %v1000_v53 = vsub.f32 1.0, %v999_v26  ;;  %v1909_v58 = vpop.eup %1908  ;;  %v948_v60 = vmul.f32 0.3275911, %v2492_v48  ;;  %v2505_v8 = vadd.f32 %v823_v55, %v775_v17  ;;  %vm1008_vm8 = vcmp.eq.f32.partialorder %v1007_v45, 8.507059e+37 }
 0x19b   : > { %v1304_v57 = vmul.f32 %v1288_v33, %v2414_v28  ;;  %v1266_v14 = vadd.f32 1.4214138, %v1250_v7  ;;  %v1241_v56 = vmul.f32 %v1225_v15, %v2465_v35  ;;  %v1141_v32 = vsel %vm2473_vm1, %v1903_v34, %v1137_v21 }
 0x19c   : > { %v2494_v36 = vsel %vm1143_vm2, %v1145_v13, %v1141_v32  ;;  %v1009_v34 = vand.u32 2147483648, %v2450_v46  ;;  %v1001_v6 = vmul.f32 %v1905_v11, %v1000_v53  ;;  %v2503_v9 = vadd.f32 1.0, %v948_v60 }
 0x19d   : > { %v1320_v19 = vadd.f32 0.2548296, %v1304_v57  ;;  %v1282_v22 = vmul.f32 %v1266_v14, %v2448_v39  ;;  %v1257_v52 = vadd.f32 1.4214138, %v1241_v56  ;;  %v2518_v46 = vmul.f32 0.70710677, %v2505_v8 }
 0x19e   : > { %v1002_v10 = vadd.f32 %v1905_v11, %v1001_v6  ;;  %v1010_v15 = vor.u32 1.1754944e-38, %v1009_v34  ;;  %1910 = vrcp.f32 %v2503_v9  ;;  %v1388_v55 = vmul.f32 1.442695, %v1370_v41  ;;  %v799_v34 = vpop.f32.mrf.mxu3 }
 0x19f   : > { %v1336_v27 = vmul.f32 %v1320_v19, %v2414_v28  ;;  %v1298_v51 = vadd.f32 -0.28449672, %v1282_v22  ;;  %v1219_v28 = vmul.f32 1.0614054, %v2494_v36  ;;  %v1273_v33 = vmul.f32 %v1257_v52, %v2465_v35 }
 0x1a0   : > { %v1006_v19 = vsel %vm1005_vm7, %v1905_v11, %v1002_v10  ;;  %v905_v11 = vsel %vm889_vm4, 1.0, %v2023_v30  ;;  %1912 = vpow2.f32 %v1406_v20  ;;  %vm1153_vm9 = vweird.f32 %v2503_v9  ;;  %v649_v20 = vpop.permute.xlu1 %648 }
 0x1a1   : > { %v1416_v1 = vmul.f32 %v2425_v5, %v1336_v27  ;;  %v1314_v61 = vmul.f32 %v1298_v51, %v2448_v39  ;;  %v1235_v7 = vadd.f32 -1.4531521, %v1219_v28  ;;  %v1289_v57 = vadd.f32 -0.28449672, %v1273_v33 }
 0x1a2   : > { %v2515_v56 = vsel %vm1008_vm8, %v1010_v15, %v1006_v19  ;;  %v2536_v62 = vand.u32 2147483647, %v2518_v46  ;;  %v1159_v33 = vand.u32 2147483648, %v2503_v9  ;;  %v800_v10 = vadd.f32 %v799_v34, %v649_v20  ;;  %v777_v19 = vpop.f32.mrf.mxu1 }
 0x1a3   : > { %v1432_v18 = vsub.f32 1.0, %v1416_v1  ;;  %v1330_v5 = vadd.f32 0.2548296, %v1314_v61  ;;  %v1251_v14 = vmul.f32 %v1235_v7, %v2494_v36  ;;  %v1305_v17 = vmul.f32 %v1289_v57, %v2465_v35 }
 0x1a4   : > { %v1210_v32 = vmul.f32 1.0614054, %v2515_v56  ;;  %v1157_v61 = vand.u32 2147483647, %v2503_v9  ;;  %v939_v41 = vmul.f32 0.3275911, %v2536_v62 }
 0x1a5   : > { %v1448_v13 = vmul.f32 %v1432_v18, %v2402_v31  ;;  %v1346_v16 = vmul.f32 %v1330_v5, %v2448_v39  ;;  %v1267_v22 = vadd.f32 1.4214138, %v1251_v14  ;;  %v866_v31 = vmul.f32 0.5, %v2372_v59 }
 0x1a6   : > { %v1321_v27 = vadd.f32 0.2548296, %v1305_v17  ;;  %v914_v39 = vsel %vm898_vm3, 1.0, %v2023_v30  ;;  %v1226_v59 = vadd.f32 -1.4531521, %v1210_v32  ;;  %v2544_v57 = vadd.f32 1.0, %v939_v41 }
 0x1a7   : > { %v1464_v21 = vadd.f32 1.0, %v1448_v13  ;;  %v1426_v26 = vmul.f32 %v1907_v49, %v1346_v16  ;;  %v1283_v45 = vmul.f32 %v1267_v22, %v2494_v36  ;;  %v1911_v49 = vpop.eup %1910  ;;  %v857_v22 = vmul.f32 0.5, %v2379_v0 }
 0x1a8   : > { %v1337_v53 = vmul.f32 %v1321_v27, %v2465_v35  ;;  %v1242_v28 = vmul.f32 %v1226_v59, %v2515_v56  ;;  %v1149_v35 = vmul.f32 %v1911_v49, %v2503_v9  ;;  %vm1154_vm10 = vweird.f32 %v1911_v49  ;;  %v1913_v13 = vpop.eup %1912 }
 0x1a9   : > { %v1480_v51 = vmul.f32 %v1464_v21, %v2395_v25  ;;  %v1442_v52 = vsub.f32 1.0, %v1426_v26  ;;  %v1299_v25 = vadd.f32 -0.28449672, %v1283_v45  ;;  %v848_v21 = vpop.f32.mrf.mxu2  ;;  %vm899_vm11 = vcmp.ge.f32.partialorder %v2393_v24, 0.0  ;;  %vm1155_vm12 = vmor %vm1153_vm9, %vm1154_vm10 }
 0x1aa   : > { %v1417_v1 = vmul.f32 %v1909_v58, %v1337_v53  ;;  %v1258_v7 = vadd.f32 1.4214138, %v1242_v28  ;;  %v1150_v5 = vsub.f32 1.0, %v1149_v35  ;;  %1914 = vrcp.f32 %v2544_v57  ;;  %v826_v53 = vpop.f32.mrf.mxu0 }
 0x1ab   : > { %1496 = vst [vmem:[%s2531_s8] sm:$0xff] %v1480_v51  ;;  %v1458_v4 = vmul.f32 %v1442_v52, %v914_v39  ;;  %v1315_v60 = vmul.f32 %v1299_v25, %v2494_v36  ;;  %1916 = vpow2.f32 %v1388_v55  ;;  %v1160_v39 = vor.u32 1.1754944e-38, %v1159_v33 }
 0x1ac   : > { %v1433_v18 = vsub.f32 1.0, %v1417_v1  ;;  %v1274_v16 = vmul.f32 %v1258_v7, %v2515_v56  ;;  %v1151_v17 = vmul.f32 %v1911_v49, %v1150_v5  ;;  %v778_v0 = vadd.f32 %v777_v19, %v2356_v38 }
 0x1ad   : > { %v1474_v6 = vadd.f32 1.0, %v1458_v4  ;;  %v1331_v58 = vadd.f32 0.2548296, %v1315_v60  ;;  %vm1158_vm13 = vcmp.eq.f32.partialorder %v1157_v61, 8.507059e+37  ;;  %vm890_vm14 = vcmp.ge.f32.partialorder %v2410_v54, 0.0 }
 0x1ae   : > { %v1449_v15 = vmul.f32 %v1433_v18, %v905_v11  ;;  %v1290_v32 = vadd.f32 -0.28449672, %v1274_v16  ;;  %v2556_v11 = vadd.f32 %v848_v21, %v800_v10  ;;  %v1364_v55 = vsub.f32 0.0, %v2492_v48  ;;  %v654_v10 = vpop.permute.xlu2 %653 }
 0x1af   : > { %v1490_v14 = vmul.f32 %v1474_v6, %v866_v31  ;;  %v1347_v26 = vmul.f32 %v1331_v58, %v2494_v36  ;;  %v1152_v31 = vadd.f32 %v1911_v49, %v1151_v17  ;;  %v915_v38 = vsel %vm899_vm11, 1.0, %v2023_v30 }
 0x1b0   : > { %v1465_v27 = vadd.f32 1.0, %v1449_v15  ;;  %v1306_v36 = vmul.f32 %v1290_v32, %v2515_v56  ;;  %v1915_v1 = vpop.eup %1914  ;;  %v2570_v35 = vmul.f32 0.70710677, %v2556_v11  ;;  %v2572_v54 = vadd.f32 %v826_v53, %v778_v0 }
 0x1b1   : > { %1506 = vst [vmem:[%s2531_s8 + $0x50] sm:$0xff] %v1490_v14  ;;  %v1427_v51 = vmul.f32 %v1913_v13, %v1347_v26  ;;  %v1156_v52 = vsel %vm1155_vm12, %v1911_v49, %v1152_v31  ;;  %v867_v49 = vmul.f32 0.5, %v2386_v12  ;;  %v1917_v20 = vpop.eup %1916  ;;  %v906_v34 = vsel %vm890_vm14, 1.0, %v2023_v30  ;;  %v851_v0 = vpop.f32.mrf.mxu2 }
 0x1b2   : > { %v1481_v45 = vmul.f32 %v1465_v27, %v857_v22  ;;  %v2560_v25 = vsel %vm1158_vm13, %v1160_v39, %v1156_v52  ;;  %v1322_v9 = vadd.f32 0.2548296, %v1306_v36  ;;  %v1014_v24 = vmul.f32 %v1915_v1, %v2544_v57  ;;  %v779_v39 = vpop.f32.mrf.mxu1 }
 0x1b3   : > { %v1443_v59 = vsub.f32 1.0, %v1427_v51  ;;  %v1220_v4 = vmul.f32 1.0614054, %v2560_v25  ;;  %v1380_v41 = vmul.f32 %v1364_v55, %v2492_v48  ;;  %v1355_v6 = vsub.f32 0.0, %v2536_v62 }
 0x1b4   : > { %1497 = vst [vmem:[%s2531_s8 + $0x8] sm:$0xff] %v1481_v45  ;;  %v1338_v60 = vmul.f32 %v1322_v9, %v2515_v56  ;;  %v2580_v12 = vand.u32 2147483647, %v2570_v35  ;;  %v1015_v5 = vsub.f32 1.0, %v1014_v24  ;;  %v1022_v58 = vand.u32 2147483647, %v2544_v57  ;;  %v802_v56 = vpop.f32.mrf.mxu3 }
 0x1b5   : > { %v1459_v28 = vmul.f32 %v1443_v59, %v915_v38  ;;  %v1236_v61 = vadd.f32 -1.4531521, %v1220_v4  ;;  %v1024_v14 = vand.u32 2147483648, %v2544_v57  ;;  %v2587_v48 = vmul.f32 0.70710677, %v2572_v54 }
 0x1b6   : > { %v1418_v18 = vmul.f32 %v1917_v20, %v1338_v60  ;;  %v949_v15 = vmul.f32 0.3275911, %v2580_v12  ;;  %v1016_v19 = vmul.f32 %v1915_v1, %v1015_v5  ;;  %vm1019_vm15 = vweird.f32 %v1915_v1 }
 0x1b7   : > { %v1475_v33 = vadd.f32 1.0, %v1459_v28  ;;  %v1252_v7 = vmul.f32 %v1236_v61, %v2560_v25  ;;  %v1408_v21 = vmul.f32 1.442695, %v1380_v41  ;;  %v2593_v26 = vand.u32 2147483647, %v2587_v48 }
 0x1b8   : > { %v1434_v16 = vsub.f32 1.0, %v1418_v18  ;;  %v2590_v22 = vadd.f32 1.0, %v949_v15  ;;  %v803_v27 = vadd.f32 %v802_v56, %v654_v10  ;;  %v1017_v51 = vadd.f32 %v1915_v1, %v1016_v19 }
 0x1b9   : > { %v1491_v13 = vmul.f32 %v1475_v33, %v867_v49  ;;  %v1268_v17 = vadd.f32 1.4214138, %v1252_v7  ;;  %vm1018_vm0 = vweird.f32 %v2544_v57  ;;  %v858_v45 = vmul.f32 0.5, %v2398_v29 }
 0x1ba   : > { %v1450_v32 = vmul.f32 %v1434_v16, %v906_v34  ;;  %vm1020_vm1 = vmor %vm1018_vm0, %vm1019_vm15  ;;  %v1025_v36 = vor.u32 1.1754944e-38, %v1024_v14  ;;  %v1371_v52 = vmul.f32 %v1355_v6, %v2536_v62  ;;  %1918 = vrcp.f32 %v2590_v22 }
 0x1bb   : > { %1507 = vst [vmem:[%s2531_s8 + $0x58] sm:$0xff] %v1491_v13  ;;  %v1284_v31 = vmul.f32 %v1268_v17, %v2560_v25  ;;  %v1021_v55 = vsel %vm1020_vm1, %v1915_v1, %v1017_v51  ;;  %vm1023_vm2 = vcmp.eq.f32.partialorder %v1022_v58, 8.507059e+37  ;;  %1920 = vpow2.f32 %v1408_v21  ;;  %v782_v13 = vpop.f32.mrf.mxu1 }
 0x1bc   : > { %v1466_v53 = vadd.f32 1.0, %v1450_v32  ;;  %v2600_v38 = vsel %vm1023_vm2, %v1025_v36, %v1021_v55  ;;  %v940_v57 = vmul.f32 0.3275911, %v2593_v26  ;;  %v2603_v9 = vadd.f32 %v851_v0, %v803_v27 }
 0x1bd   : > { %v1300_v59 = vadd.f32 -0.28449672, %v1284_v31  ;;  %v2606_v29 = vmul.f32 0.5, %v2461_v2  ;;  %v1211_v49 = vmul.f32 1.0614054, %v2600_v38  ;;  %vm900_vm3 = vcmp.ge.f32.partialorder %v2479_v3, 0.0 }
 0x1be   : > { %v1482_v4 = vmul.f32 %v1466_v53, %v858_v45  ;;  %v2612_v1 = vmul.f32 0.5, %v2505_v8  ;;  %v1390_v28 = vmul.f32 1.442695, %v1371_v52  ;;  %v2614_v20 = vadd.f32 1.0, %v940_v57 }
 0x1bf   : > { %v1316_v62 = vmul.f32 %v1300_v59, %v2560_v25  ;;  %vm891_vm4 = vcmp.ge.f32.partialorder %v2518_v46, 0.0  ;;  %v1227_v60 = vadd.f32 -1.4531521, %v1211_v49  ;;  %v1365_v2 = vsub.f32 0.0, %v2580_v12  ;;  %v828_v46 = vpop.f32.mrf.mxu0  ;;  %v804_v49 = vpop.f32.mrf.mxu3 }
 0x1c0   : > { %1498 = vst [vmem:[%s2531_s8 + $0x10] sm:$0xff] %v1482_v4  ;;  %v1919_v61 = vpop.eup %1918  ;;  %1922 = vrcp.f32 %v2614_v20  ;;  %v780_v24 = vadd.f32 %v779_v39, %v2364_v43  ;;  %v2622_v3 = vmul.f32 0.70710677, %v2603_v9  ;;  %v916_v8 = vsel %vm900_vm3, 1.0, %v2023_v30 }
 0x1c1   : > { %v1332_v34 = vadd.f32 0.2548296, %v1316_v62  ;;  %v1243_v41 = vmul.f32 %v1227_v60, %v2600_v38  ;;  %v1164_v6 = vmul.f32 %v1919_v61, %v2590_v22  ;;  %v1921_v18 = vpop.eup %1920  ;;  %v2629_v7 = vsel %vm891_vm4, 1.0, %v2023_v30 }
 0x1c2   : > { %1924 = vpow2.f32 %v1390_v28  ;;  %v1172_v5 = vand.u32 2147483647, %v2590_v22  ;;  %v1174_v43 = vand.u32 2147483648, %v2590_v22  ;;  %v2634_v56 = vmul.f32 0.5, %v2556_v11 }
 0x1c3   : > { %v1348_v33 = vmul.f32 %v1332_v34, %v2560_v25  ;;  %v1259_v10 = vadd.f32 1.4214138, %v1243_v41  ;;  %v1165_v25 = vsub.f32 1.0, %v1164_v6  ;;  %vm1168_vm5 = vweird.f32 %v2590_v22 }
 0x1c4   : > { %v1381_v14 = vmul.f32 %v1365_v2, %v2580_v12  ;;  %v2639_v15 = vand.u32 2147483647, %v2622_v3  ;;  %v2641_v16 = vadd.f32 %v828_v46, %v780_v24  ;;  %vm1169_vm6 = vweird.f32 %v1919_v61  ;;  %v659_v24 = vpop.permute.xlu0 %658 }
 0x1c5   : > { %v1428_v58 = vmul.f32 %v1921_v18, %v1348_v33  ;;  %v1275_v19 = vmul.f32 %v1259_v10, %v2600_v38  ;;  %v1166_v21 = vmul.f32 %v1919_v61, %v1165_v25  ;;  %vm2644_vm7 = vcmp.eq.f32.partialorder %v1172_v5, 8.507059e+37  ;;  %vm1170_vm8 = vmor %vm1168_vm5, %vm1169_vm6 }
 0x1c6   : > { %v1923_v27 = vpop.eup %1922  ;;  %v1175_v32 = vor.u32 1.1754944e-38, %v1174_v43  ;;  %v950_v31 = vmul.f32 0.3275911, %v2639_v15  ;;  %v783_v12 = vadd.f32 %v782_v13, %v2377_v63  ;;  %v1037_v52 = vand.u32 2147483647, %v2614_v20 }
 0x1c7   : > { %v1444_v17 = vsub.f32 1.0, %v1428_v58  ;;  %v1291_v39 = vadd.f32 -0.28449672, %v1275_v19  ;;  %v1167_v0 = vadd.f32 %v1919_v61, %v1166_v21  ;;  %v1029_v45 = vmul.f32 %v1923_v27, %v2614_v20 }
 0x1c8   : > { %v1925_v36 = vpop.eup %1924  ;;  %v1039_v53 = vand.u32 2147483648, %v2614_v20  ;;  %v2655_v59 = vadd.f32 1.0, %v950_v31  ;;  %v2658_v55 = vmul.f32 0.70710677, %v2641_v16  ;;  %vm1034_vm9 = vweird.f32 %v1923_v27 }
 0x1c9   : > { %v1460_v51 = vmul.f32 %v1444_v17, %v916_v8  ;;  %v1307_v63 = vmul.f32 %v1291_v39, %v2600_v38  ;;  %v1171_v4 = vsel %vm1170_vm8, %v1919_v61, %v1167_v0  ;;  %v1030_v62 = vsub.f32 1.0, %v1029_v45  ;;  %v853_v0 = vpop.f32.mrf.mxu2 }
 0x1ca   : > { %v2663_v22 = vsel %vm2644_vm7, %v1175_v32, %v1171_v4  ;;  %1926 = vrcp.f32 %v2655_v59  ;;  %v2667_v28 = vadd.f32 %v2354_v37, %v783_v12  ;;  %vm901_vm10 = vcmp.ge.f32.partialorder %v2570_v35, 0.0 }
 0x1cb   : > { %v1476_v57 = vadd.f32 1.0, %v1460_v51  ;;  %v1323_v60 = vadd.f32 0.2548296, %v1307_v63  ;;  %v1221_v2 = vmul.f32 1.0614054, %v2663_v22  ;;  %v1031_v61 = vmul.f32 %v1923_v27, %v1030_v62 }
 0x1cc   : > { %v1410_v8 = vmul.f32 1.442695, %v1381_v14  ;;  %vm1033_vm11 = vweird.f32 %v2614_v20  ;;  %v805_v33 = vadd.f32 %v804_v49, %v659_v24  ;;  %v2676_v37 = vand.u32 2147483647, %v2658_v55 }
 0x1cd   : > { %v1492_v34 = vmul.f32 %v1476_v57, %v2606_v29  ;;  %v1339_v41 = vmul.f32 %v1323_v60, %v2600_v38  ;;  %v1237_v6 = vadd.f32 -1.4531521, %v1221_v2  ;;  %v1032_v46 = vadd.f32 %v1923_v27, %v1031_v61  ;;  %vm1035_vm12 = vmor %vm1033_vm11, %vm1034_vm9 }
 0x1ce   : > { %vm1038_vm13 = vcmp.eq.f32.partialorder %v1037_v52, 8.507059e+37  ;;  %v1040_v29 = vor.u32 1.1754944e-38, %v1039_v53  ;;  %v1356_v18 = vsub.f32 0.0, %v2593_v26  ;;  %v2681_v5 = vmul.f32 0.70710677, %v2667_v28 }
 0x1cf   : > { %1508 = vst [vmem:[%s2531_s8 + $0x60] sm:$0xff] %v1492_v34  ;;  %v1419_v43 = vmul.f32 %v1925_v36, %v1339_v41  ;;  %v1253_v20 = vmul.f32 %v1237_v6, %v2663_v22  ;;  %v1036_v58 = vsel %vm1035_vm12, %v1923_v27, %v1032_v46  ;;  %v941_v38 = vmul.f32 0.3275911, %v2676_v37 }
 0x1d0   : > { %v1927_v10 = vpop.eup %1926  ;;  %v2688_v25 = vsel %vm901_vm10, 1.0, %v2023_v30  ;;  %1928 = vpow2.f32 %v1410_v8  ;;  %v2691_v13 = vmul.f32 0.5, %v2572_v54  ;;  %v2693_v14 = vsel %vm1038_vm13, %v1040_v29, %v1036_v58 }
 0x1d1   : > { %v1435_v17 = vsub.f32 1.0, %v1419_v43  ;;  %v1269_v19 = vadd.f32 1.4214138, %v1253_v20  ;;  %v1212_v21 = vmul.f32 1.0614054, %v2693_v14  ;;  %v1179_v27 = vmul.f32 %v1927_v10, %v2655_v59 }
 0x1d2   : > { %v1372_v11 = vmul.f32 %v1356_v18, %v2593_v26  ;;  %v1366_v32 = vsub.f32 0.0, %v2639_v15  ;;  %v2699_v31 = vadd.f32 1.0, %v941_v38  ;;  %v2702_v35 = vand.u32 2147483647, %v2681_v5 }
 0x1d3   : > { %v1451_v54 = vmul.f32 %v1435_v17, %v2629_v7  ;;  %v1285_v12 = vmul.f32 %v1269_v19, %v2663_v22  ;;  %v1228_v51 = vadd.f32 -1.4531521, %v1212_v21  ;;  %v1180_v39 = vsub.f32 1.0, %v1179_v27 }
 0x1d4   : > { %vm1184_vm14 = vweird.f32 %v1927_v10  ;;  %v1187_v45 = vand.u32 2147483647, %v2655_v59  ;;  %v1189_v36 = vand.u32 2147483648, %v2655_v59  ;;  %1930 = vrcp.f32 %v2699_v31 }
 0x1d5   : > { %v1467_v26 = vadd.f32 1.0, %v1451_v54  ;;  %v1301_v52 = vadd.f32 -0.28449672, %v1285_v12  ;;  %v1244_v53 = vmul.f32 %v1228_v51, %v2693_v14  ;;  %v1181_v57 = vmul.f32 %v1927_v10, %v1180_v39 }
 0x1d6   : > { %v1929_v63 = vpop.eup %1928  ;;  %vm1183_vm15 = vweird.f32 %v2655_v59  ;;  %v1382_v7 = vmul.f32 %v1366_v32, %v2639_v15  ;;  %v942_v4 = vmul.f32 0.3275911, %v2702_v35  ;;  %v2713_v62 = vadd.f32 %v853_v0, %v805_v33 }
 0x1d7   : > { %v1483_v49 = vmul.f32 %v1467_v26, %v2612_v1  ;;  %v1317_v34 = vmul.f32 %v1301_v52, %v2663_v22  ;;  %v1260_v60 = vadd.f32 1.4214138, %v1244_v53  ;;  %v1182_v2 = vadd.f32 %v1927_v10, %v1181_v57  ;;  %vm1185_vm1 = vmor %vm1183_vm15, %vm1184_vm14 }
 0x1d8   : > { %vm892_vm0 = vcmp.ge.f32.partialorder %v2587_v48, 0.0  ;;  %v1392_v24 = vmul.f32 1.442695, %v1372_v11  ;;  %v1190_v61 = vor.u32 1.1754944e-38, %v1189_v36  ;;  %v2719_v8 = vadd.f32 1.0, %v942_v4 }
 0x1d9   : > { %1499 = vst [vmem:[%s2531_s8 + $0x18] sm:$0xff] %v1483_v49  ;;  %v1333_v15 = vadd.f32 0.2548296, %v1317_v34  ;;  %v1276_v59 = vmul.f32 %v1260_v60, %v2693_v14  ;;  %v1186_v33 = vsel %vm1185_vm1, %v1927_v10, %v1182_v2  ;;  %vm1188_vm2 = vcmp.eq.f32.partialorder %v1187_v45, 8.507059e+37 }
 0x1da   : > { %v1931_v41 = vpop.eup %1930  ;;  %v2723_v1 = vsel %vm1188_vm2, %v1190_v61, %v1186_v33  ;;  %v1412_v6 = vmul.f32 1.442695, %v1382_v7  ;;  %1932 = vrcp.f32 %v2719_v8  ;;  %v2727_v46 = vmul.f32 0.70710677, %v2713_v62 }
 0x1db   : > { %v1349_v29 = vmul.f32 %v1333_v15, %v2663_v22  ;;  %v1292_v18 = vadd.f32 -0.28449672, %v1276_v59  ;;  %v1222_v43 = vmul.f32 1.0614054, %v2723_v1  ;;  %v1044_v20 = vmul.f32 %v1931_v41, %v2699_v31  ;;  %v784_v22 = vpop.f32.mrf.mxu1 }
 0x1dc   : > { %v908_v58 = vsel %vm892_vm0, 1.0, %v2023_v30  ;;  %1934 = vpow2.f32 %v1392_v24  ;;  %v1052_v38 = vand.u32 2147483647, %v2699_v31  ;;  %v1357_v10 = vsub.f32 0.0, %v2676_v37 }
 0x1dd   : > { %v1429_v17 = vmul.f32 %v1929_v63, %v1349_v29  ;;  %v1308_v19 = vmul.f32 %v1292_v18, %v2693_v14  ;;  %v1238_v21 = vadd.f32 -1.4531521, %v1222_v43  ;;  %v1045_v27 = vsub.f32 1.0, %v1044_v20 }
 0x1de   : > { %1936 = vpow2.f32 %v1412_v6  ;;  %vm1049_vm3 = vweird.f32 %v1931_v41  ;;  %v1054_v11 = vand.u32 2147483648, %v2699_v31  ;;  %v2740_v32 = vand.u32 2147483647, %v2727_v46 }
 0x1df   : > { %v1445_v48 = vsub.f32 1.0, %v1429_v17  ;;  %v1324_v54 = vadd.f32 0.2548296, %v1308_v19  ;;  %v1254_v12 = vmul.f32 %v1238_v21, %v2723_v1  ;;  %v1046_v51 = vmul.f32 %v1931_v41, %v1045_v27 }
 0x1e0   : > { %v1933_v39 = vpop.eup %1932  ;;  %vm1048_vm4 = vweird.f32 %v2699_v31  ;;  %vm2744_vm5 = vcmp.eq.f32.partialorder %v1052_v38, 8.507059e+37  ;;  %v1373_v45 = vmul.f32 %v1357_v10, %v2676_v37  ;;  %v951_v36 = vmul.f32 0.3275911, %v2740_v32 }
 0x1e1   : > { %v1461_v26 = vmul.f32 %v1445_v48, %v2688_v25  ;;  %v1340_v52 = vmul.f32 %v1324_v54, %v2693_v14  ;;  %vm902_vm6 = vcmp.ge.f32.partialorder %v2622_v3, 0.0  ;;  %v1270_v53 = vadd.f32 1.4214138, %v1254_v12  ;;  %vm1050_vm7 = vmor %vm1048_vm4, %vm1049_vm3 }
 0x1e2   : > { %v1047_v57 = vadd.f32 %v1931_v41, %v1046_v51  ;;  %v1935_v63 = vpop.eup %1934  ;;  %v1055_v31 = vor.u32 1.1754944e-38, %v1054_v11  ;;  %v1059_v7 = vmul.f32 %v1933_v39, %v2719_v8  ;;  %v1358_v4 = vsub.f32 0.0, %v2702_v35 }
 0x1e3   : > { %v2756_v49 = vadd.f32 1.0, %v951_v36  ;;  %v1477_v37 = vadd.f32 1.0, %v1461_v26  ;;  %v1420_v34 = vmul.f32 %v1935_v63, %v1340_v52  ;;  %v1286_v25 = vmul.f32 %v1270_v53, %v2723_v1  ;;  %v787_v17 = vpop.f32.mrf.mxu1 }
 0x1e4   : > { %v1051_v14 = vsel %vm1050_vm7, %v1931_v41, %v1047_v57  ;;  %v1937_v60 = vpop.eup %1936  ;;  %v1060_v24 = vsub.f32 1.0, %v1059_v7  ;;  %v1069_v61 = vand.u32 2147483648, %v2719_v8  ;;  %v1394_v29 = vmul.f32 1.442695, %v1373_v45 }
 0x1e5   : > { %v2761_v2 = vsel %vm2744_vm5, %v1055_v31, %v1051_v14  ;;  %1938 = vrcp.f32 %v2756_v49  ;;  %v1493_v15 = vmul.f32 %v1477_v37, %v2634_v56  ;;  %v1436_v59 = vsub.f32 1.0, %v1420_v34 }
 0x1e6   : > { %v1302_v33 = vadd.f32 -0.28449672, %v1286_v25  ;;  %v1213_v6 = vmul.f32 1.0614054, %v2761_v2  ;;  %v1061_v18 = vmul.f32 %v1933_v39, %v1060_v24  ;;  %vm1064_vm8 = vweird.f32 %v1933_v39 }
 0x1e7   : > { %v1067_v41 = vand.u32 2147483647, %v2719_v8  ;;  %1509 = vst [vmem:[%s2531_s8 + $0x68] sm:$0xff] %v1493_v15  ;;  %v1452_v43 = vmul.f32 %v1436_v59, %v908_v58  ;;  %v785_v10 = vadd.f32 %v784_v22, %v2366_v44  ;;  %vm1063_vm9 = vweird.f32 %v2719_v8 }
 0x1e8   : > { %v1318_v20 = vmul.f32 %v1302_v33, %v2723_v1  ;;  %v1229_v38 = vadd.f32 -1.4531521, %v1213_v6  ;;  %v1062_v19 = vadd.f32 %v1933_v39, %v1061_v18  ;;  %v1070_v56 = vor.u32 1.1754944e-38, %v1069_v61  ;;  %vm1065_vm10 = vmor %vm1063_vm9, %vm1064_vm8 }
 0x1e9   : > { %v1374_v21 = vmul.f32 %v1358_v4, %v2702_v35  ;;  %v1468_v27 = vadd.f32 1.0, %v1452_v43  ;;  %v2776_v58 = vadd.f32 %v2358_v40, %v785_v10  ;;  %v870_v44 = vmul.f32 0.5, %v2603_v9 }
 0x1ea   : > { %v1334_v11 = vadd.f32 0.2548296, %v1318_v20  ;;  %v1245_v48 = vmul.f32 %v1229_v38, %v2761_v2  ;;  %v1066_v22 = vsel %vm1065_vm10, %v1933_v39, %v1062_v19  ;;  %vm1068_vm11 = vcmp.eq.f32.partialorder %v1067_v41, 8.507059e+37 }
 0x1eb   : > { %v1939_v54 = vpop.eup %1938  ;;  %v788_v8 = vadd.f32 %v787_v17, %v2370_v50  ;;  %v1484_v12 = vmul.f32 %v1468_v27, %v2691_v13  ;;  %v2782_v0 = vsel %vm1068_vm11, %v1070_v56, %v1066_v22  ;;  %v918_v45 = vsel %vm902_vm6, 1.0, %v2023_v30  ;;  %v789_v14 = vpop.f32.mrf.mxu1 }
 0x1ec   : > { %v1350_v35 = vmul.f32 %v1334_v11, %v2723_v1  ;;  %v1261_v51 = vadd.f32 1.4214138, %v1245_v48  ;;  %1940 = vpow2.f32 %v1394_v29  ;;  %v1214_v40 = vmul.f32 1.0614054, %v2782_v0 }
 0x1ed   : > { %v1194_v9 = vmul.f32 %v1939_v54, %v2756_v49  ;;  %1500 = vst [vmem:[%s2531_s8 + $0x20] sm:$0xff] %v1484_v12  ;;  %v1396_v36 = vmul.f32 1.442695, %v1374_v21  ;;  %v2792_v13 = vmul.f32 0.70710677, %v2776_v58  ;;  %v2796_v3 = vadd.f32 %v2362_v42, %v788_v8 }
 0x1ee   : > { %v1430_v39 = vmul.f32 %v1937_v60, %v1350_v35  ;;  %v1277_v50 = vmul.f32 %v1261_v51, %v2761_v2  ;;  %v1230_v1 = vadd.f32 -1.4531521, %v1214_v40  ;;  %v1202_v52 = vand.u32 2147483647, %v2756_v49 }
 0x1ef   : > { %v1195_v26 = vsub.f32 1.0, %v1194_v9  ;;  %v1204_v63 = vand.u32 2147483648, %v2756_v49  ;;  %v2800_v31 = vand.u32 2147483647, %v2792_v13  ;;  %vm1199_vm12 = vweird.f32 %v1939_v54 }
 0x1f0   : > { %v1446_v53 = vsub.f32 1.0, %v1430_v39  ;;  %v1293_v57 = vadd.f32 -0.28449672, %v1277_v50  ;;  %v1246_v7 = vmul.f32 %v1230_v1, %v2782_v0  ;;  %v1367_v37 = vsub.f32 0.0, %v2740_v32 }
 0x1f1   : > { %v1196_v4 = vmul.f32 %v1939_v54, %v1195_v26  ;;  %vm1198_vm13 = vweird.f32 %v2756_v49  ;;  %v943_v42 = vmul.f32 0.3275911, %v2800_v31  ;;  %vm1203_vm14 = vcmp.eq.f32.partialorder %v1202_v52, 8.507059e+37 }
 0x1f2   : > { %v1462_v34 = vmul.f32 %v1446_v53, %v918_v45  ;;  %v1309_v25 = vmul.f32 %v1293_v57, %v2761_v2  ;;  %v1941_v60 = vpop.eup %1940  ;;  %v1262_v24 = vadd.f32 1.4214138, %v1246_v7  ;;  %v2808_v15 = vmul.f32 0.70710677, %v2796_v3  ;;  %vm1200_vm15 = vmor %vm1198_vm13, %vm1199_vm12 }
 0x1f3   : > { %v1197_v61 = vadd.f32 %v1939_v54, %v1196_v4  ;;  %v1205_v6 = vor.u32 1.1754944e-38, %v1204_v63  ;;  %v959_v29 = vadd.f32 1.0, %v943_v42  ;;  %v790_v43 = vadd.f32 %v789_v14, %v2390_v23 }
 0x1f4   : > { %v1478_v59 = vadd.f32 1.0, %v1462_v34  ;;  %v1325_v33 = vadd.f32 0.2548296, %v1309_v25  ;;  %v1278_v18 = vmul.f32 %v1262_v24, %v2782_v0  ;;  %v2812_v49 = vand.u32 2147483647, %v2808_v15 }
 0x1f5   : > { %v1201_v41 = vsel %vm1200_vm15, %v1939_v54, %v1197_v61  ;;  %1942 = vrcp.f32 %v959_v29  ;;  %vm893_vm0 = vcmp.ge.f32.partialorder %v2658_v55, 0.0  ;;  %v1383_v23 = vmul.f32 %v1367_v37, %v2740_v32 }
 0x1f6   : > { %v1494_v20 = vmul.f32 %v1478_v59, %v870_v44  ;;  %v1341_v38 = vmul.f32 %v1325_v33, %v2761_v2  ;;  %v1206_v10 = vsel %vm1203_vm14, %v1205_v6, %v1201_v41  ;;  %v1294_v17 = vadd.f32 -0.28449672, %v1278_v18 }
 0x1f7   : > { %v1223_v19 = vmul.f32 1.0614054, %v1206_v10  ;;  %1944 = vpow2.f32 %v1396_v36  ;;  %v944_v11 = vmul.f32 0.3275911, %v2812_v49  ;;  %v2822_v54 = vadd.f32 %v2368_v47, %v790_v43 }
 0x1f8   : > { %1510 = vst [vmem:[%s2531_s8 + $0x70] sm:$0xff] %v1494_v20  ;;  %v1421_v56 = vmul.f32 %v1941_v60, %v1341_v38  ;;  %v1310_v21 = vmul.f32 %v1294_v17, %v2782_v0  ;;  %v909_v2 = vsel %vm893_vm0, 1.0, %v2023_v30  ;;  %v861_v35 = vmul.f32 0.5, %v2641_v16 }
 0x1f9   : > { %v1239_v27 = vadd.f32 -1.4531521, %v1223_v19  ;;  %v2825_v8 = vadd.f32 1.0, %v944_v11  ;;  %v1414_v39 = vmul.f32 1.442695, %v1383_v23  ;;  %vm894_vm1 = vcmp.ge.f32.partialorder %v2681_v5, 0.0 }
 0x1fa   : > { %v1437_v48 = vsub.f32 1.0, %v1421_v56  ;;  %v1326_v44 = vadd.f32 0.2548296, %v1310_v21  ;;  %v2831_v47 = vmul.f32 0.70710677, %v2822_v54  ;;  %v1084_v52 = vand.u32 2147483648, %v959_v29 }
 0x1fb   : > { %v1255_v22 = vmul.f32 %v1239_v27, %v1206_v10  ;;  %v1943_v55 = vpop.eup %1942  ;;  %1946 = vrcp.f32 %v2825_v8  ;;  %v1082_v16 = vand.u32 2147483647, %v959_v29  ;;  %v910_v63 = vsel %vm894_vm1, 1.0, %v2023_v30 }
 0x1fc   : > { %v1453_v12 = vmul.f32 %v1437_v48, %v909_v2  ;;  %v1342_v51 = vmul.f32 %v1326_v44, %v2782_v0  ;;  %v1074_v40 = vmul.f32 %v1943_v55, %v959_v29  ;;  %vm1079_vm2 = vweird.f32 %v1943_v55 }
 0x1fd   : > { %v1271_v45 = vadd.f32 1.4214138, %v1255_v22  ;;  %v1945_v9 = vpop.eup %1944  ;;  %1948 = vpow2.f32 %v1414_v39  ;;  %v2837_v7 = vand.u32 2147483647, %v2831_v47  ;;  %vm1078_vm3 = vweird.f32 %v959_v29 }
 0x1fe   : > { %v1469_v32 = vadd.f32 1.0, %v1453_v12  ;;  %v1422_v50 = vmul.f32 %v1945_v9, %v1342_v51  ;;  %v1075_v1 = vsub.f32 1.0, %v1074_v40  ;;  %v862_v25 = vmul.f32 0.5, %v2667_v28  ;;  %vm1080_vm4 = vmor %vm1078_vm3, %vm1079_vm2 }
 0x1ff   : > { %v1287_v36 = vmul.f32 %v1271_v45, %v1206_v10  ;;  %vm1083_vm5 = vcmp.eq.f32.partialorder %v1082_v16, 8.507059e+37  ;;  %v1085_v42 = vor.u32 1.1754944e-38, %v1084_v52  ;;  %v945_v14 = vmul.f32 0.3275911, %v2837_v7 }
 0x200   : > { %v1485_v26 = vmul.f32 %v1469_v32, %v861_v35  ;;  %v1438_v0 = vsub.f32 1.0, %v1422_v50  ;;  %v1076_v57 = vmul.f32 %v1943_v55, %v1075_v1  ;;  %v1359_v6 = vsub.f32 0.0, %v2800_v31 }
 0x201   : > { %v1303_v53 = vadd.f32 -0.28449672, %v1287_v36  ;;  %v1947_v34 = vpop.eup %1946  ;;  %v961_v18 = vadd.f32 1.0, %v945_v14  ;;  %vm903_vm6 = vcmp.ge.f32.partialorder %v2727_v46, 0.0  ;;  %v1097_v38 = vand.u32 2147483647, %v2825_v8 }
 0x202   : > { %1501 = vst [vmem:[%s2531_s8 + $0x28] sm:$0xff] %v1485_v26  ;;  %v1454_v4 = vmul.f32 %v1438_v0, %v910_v63  ;;  %v1077_v5 = vadd.f32 %v1943_v55, %v1076_v57  ;;  %v1089_v59 = vmul.f32 %v1947_v34, %v2825_v8  ;;  %v1099_v17 = vand.u32 2147483648, %v2825_v8 }
 0x203   : > { %v1319_v37 = vmul.f32 %v1303_v53, %v1206_v10  ;;  %v1949_v28 = vpop.eup %1948  ;;  %1950 = vrcp.f32 %v961_v18  ;;  %vm1094_vm7 = vweird.f32 %v1947_v34  ;;  %v1375_v27 = vmul.f32 %v1359_v6, %v2800_v31 }
 0x204   : > { %v1470_v60 = vadd.f32 1.0, %v1454_v4  ;;  %v1081_v61 = vsel %vm1080_vm4, %v1943_v55, %v1077_v5  ;;  %v1090_v20 = vsub.f32 1.0, %v1089_v59  ;;  %vm1093_vm8 = vweird.f32 %v2825_v8 }
 0x205   : > { %v1335_v24 = vadd.f32 0.2548296, %v1319_v37  ;;  %v1086_v33 = vsel %vm1083_vm5, %v1085_v42, %v1081_v61  ;;  %v919_v23 = vsel %vm903_vm6, 1.0, %v2023_v30  ;;  %vm1095_vm9 = vmor %vm1093_vm8, %vm1094_vm7  ;;  %v1100_v46 = vor.u32 1.1754944e-38, %v1099_v17 }
 0x206   : > { %v1486_v41 = vmul.f32 %v1470_v60, %v862_v25  ;;  %v1215_v43 = vmul.f32 1.0614054, %v1086_v33  ;;  %v1091_v21 = vmul.f32 %v1947_v34, %v1090_v20  ;;  %vm1098_vm10 = vcmp.eq.f32.partialorder %v1097_v38, 8.507059e+37 }
 0x207   : > { %v1351_v29 = vmul.f32 %v1335_v24, %v1206_v10  ;;  %v871_v12 = vmul.f32 0.5, %v2713_v62  ;;  %v1398_v35 = vmul.f32 1.442695, %v1375_v27  ;;  %v1360_v31 = vsub.f32 0.0, %v2812_v49 }
 0x208   : > { %1502 = vst [vmem:[%s2531_s8 + $0x30] sm:$0xff] %v1486_v41  ;;  %v1231_v56 = vadd.f32 -1.4531521, %v1215_v43  ;;  %v1092_v10 = vadd.f32 %v1947_v34, %v1091_v21  ;;  %v1112_v26 = vand.u32 2147483647, %v961_v18  ;;  %v1114_v16 = vand.u32 2147483648, %v961_v18 }
 0x209   : > { %v1431_v19 = vmul.f32 %v1949_v28, %v1351_v29  ;;  %v1951_v55 = vpop.eup %1950  ;;  %1952 = vpow2.f32 %v1398_v35  ;;  %v1376_v1 = vmul.f32 %v1360_v31, %v2812_v49  ;;  %vm1108_vm12 = vweird.f32 %v961_v18 }
 0x20a   : > { %v1247_v48 = vmul.f32 %v1231_v56, %v1086_v33  ;;  %v1096_v22 = vsel %vm1095_vm9, %v1947_v34, %v1092_v10  ;;  %v1104_v8 = vmul.f32 %v1951_v55, %v961_v18  ;;  %vm1109_vm11 = vweird.f32 %v1951_v55 }
 0x20b   : > { %v1447_v11 = vsub.f32 1.0, %v1431_v19  ;;  %v1101_v51 = vsel %vm1098_vm10, %v1100_v46, %v1096_v22  ;;  %v1400_v4 = vmul.f32 1.442695, %v1376_v1  ;;  %vm1110_vm13 = vmor %vm1108_vm12, %vm1109_vm11  ;;  %v1115_v37 = vor.u32 1.1754944e-38, %v1114_v16 }
 0x20c   : > { %v1263_v44 = vadd.f32 1.4214138, %v1247_v48  ;;  %v1216_v9 = vmul.f32 1.0614054, %v1101_v51  ;;  %v1105_v36 = vsub.f32 1.0, %v1104_v8  ;;  %vm1113_vm14 = vcmp.eq.f32.partialorder %v1112_v26, 8.507059e+37 }
 0x20d   : > { %v1463_v2 = vmul.f32 %v1447_v11, %v919_v23  ;;  %v1361_v14 = vsub.f32 0.0, %v2837_v7  ;;  %vm895_vm15 = vcmp.ge.f32.partialorder %v2792_v13, 0.0  ;;  %1954 = vpow2.f32 %v1400_v4 }
 0x20e   : > { %v1279_v40 = vmul.f32 %v1263_v44, %v1086_v33  ;;  %v1232_v50 = vadd.f32 -1.4531521, %v1216_v9  ;;  %v1106_v0 = vmul.f32 %v1951_v55, %v1105_v36  ;;  %v911_v41 = vsel %vm895_vm15, 1.0, %v2023_v30 }
 0x20f   : > { %v1479_v45 = vadd.f32 1.0, %v1463_v2  ;;  %v1953_v42 = vpop.eup %1952  ;;  %v863_v28 = vmul.f32 0.5, %v2776_v58  ;;  %vm896_vm0 = vcmp.ge.f32.partialorder %v2808_v15, 0.0  ;;  %v864_v46 = vmul.f32 0.5, %v2796_v3 }
 0x210   : > { %v1295_v39 = vadd.f32 -0.28449672, %v1279_v40  ;;  %v1248_v52 = vmul.f32 %v1232_v50, %v1101_v51  ;;  %v1107_v63 = vadd.f32 %v1951_v55, %v1106_v0  ;;  %v912_v10 = vsel %vm896_vm0, 1.0, %v2023_v30 }
 0x211   : > { %v1495_v32 = vmul.f32 %v1479_v45, %v871_v12  ;;  %vm897_vm1 = vcmp.ge.f32.partialorder %v2831_v47, 0.0  ;;  %v865_v31 = vmul.f32 0.5, %v2822_v54 }
 0x212   : > { %v1311_v62 = vmul.f32 %v1295_v39, %v1086_v33  ;;  %v1264_v57 = vadd.f32 1.4214138, %v1248_v52  ;;  %v1111_v25 = vsel %vm1110_vm13, %v1951_v55, %v1107_v63  ;;  %v913_v3 = vsel %vm897_vm1, 1.0, %v2023_v30 }
 0x213   : > { %1511 = vst [vmem:[%s2531_s8 + $0x78] sm:$0xff] %v1495_v32  ;;  %v1116_v49 = vsel %vm1113_vm14, %v1115_v37, %v1111_v25  ;;  %v1955_v19 = vpop.eup %1954 }
 0x214   : > { %v1327_v53 = vadd.f32 0.2548296, %v1311_v62  ;;  %v1280_v34 = vmul.f32 %v1264_v57, %v1101_v51  ;;  %v1217_v61 = vmul.f32 1.0614054, %v1116_v49 }
 0x216   : > { %v1343_v5 = vmul.f32 %v1327_v53, %v1086_v33  ;;  %v1296_v24 = vadd.f32 -0.28449672, %v1280_v34  ;;  %v1233_v18 = vadd.f32 -1.4531521, %v1217_v61  ;;  %v1377_v33 = vmul.f32 %v1361_v14, %v2837_v7 }
 0x218   : > { %v1423_v60 = vmul.f32 %v1953_v42, %v1343_v5  ;;  %v1312_v6 = vmul.f32 %v1296_v24, %v1101_v51  ;;  %v1249_v20 = vmul.f32 %v1233_v18, %v1116_v49  ;;  %v1402_v56 = vmul.f32 1.442695, %v1377_v33 }
 0x21a   : > { %v1439_v59 = vsub.f32 1.0, %v1423_v60  ;;  %v1328_v43 = vadd.f32 0.2548296, %v1312_v6  ;;  %v1265_v13 = vadd.f32 1.4214138, %v1249_v20  ;;  %1956 = vpow2.f32 %v1402_v56 }
 0x21c   : > { %v1455_v29 = vmul.f32 %v1439_v59, %v911_v41  ;;  %v1344_v17 = vmul.f32 %v1328_v43, %v1101_v51  ;;  %v1281_v11 = vmul.f32 %v1265_v13, %v1116_v49 }
 0x21e   : > { %v1471_v38 = vadd.f32 1.0, %v1455_v29  ;;  %v1424_v27 = vmul.f32 %v1955_v19, %v1344_v17  ;;  %v1297_v7 = vadd.f32 -0.28449672, %v1281_v11 }
 0x220   : > { %v1487_v21 = vmul.f32 %v1471_v38, %v863_v28  ;;  %v1440_v48 = vsub.f32 1.0, %v1424_v27  ;;  %v1313_v58 = vmul.f32 %v1297_v7, %v1116_v49  ;;  %v1957_v15 = vpop.eup %1956 }
 0x222   : > { %1503 = vst [vmem:[%s2531_s8 + $0x38] sm:$0xff] %v1487_v21  ;;  %v1456_v23 = vmul.f32 %v1440_v48, %v912_v10  ;;  %v1329_v44 = vadd.f32 0.2548296, %v1313_v58 }
 0x224   : > { %v1472_v2 = vadd.f32 1.0, %v1456_v23  ;;  %v1345_v55 = vmul.f32 %v1329_v44, %v1116_v49 }
 0x226   : > { %v1488_v22 = vmul.f32 %v1472_v2, %v864_v46  ;;  %v1425_v12 = vmul.f32 %v1957_v15, %v1345_v55 }
 0x228   : > { %1504 = vst [vmem:[%s2531_s8 + $0x40] sm:$0xff] %v1488_v22  ;;  %v1441_v35 = vsub.f32 1.0, %v1425_v12 }
 0x22a   : > { %v1457_v51 = vmul.f32 %v1441_v35, %v913_v3 }
 0x22c   : > { %v1473_v45 = vadd.f32 1.0, %v1457_v51 }
 0x22e   : > { %v1489_v40 = vmul.f32 %v1473_v45, %v865_v31 }
 0x230   : > { %1505 = vst [vmem:[%s2531_s8 + $0x48] sm:$0xff] %v1489_v40 }
 0x231   : > { %1985 = shalt.err (!%p1982_p3)
}
 0x232   : > { %s2024_s5 = smov 128   ;;  %s2025_s6 = smov 8  }
 0x233   : > { %1848 = dma.vmem_to_hbm [thread:$0]  (%p2089_p5), %s1526_s13, 2048, %s1528_s14, %s1513_s19, %s2024_s5, %s2024_s5, %s2025_s6  }
 0x234 PF: > { %p1854_p4 = scmp.ge.s32.totalorder %s2020_s18, 2  ;;  %s1542_s7 = sand.u32 1, %s2008_s15  }
 0x235   : > { %s1543_s8 = scalar_lea.sflag [#allocation3], %s1542_s7 }
 0x236   : > { %p1851_p7 = pnand %p1854_p4, %p2093_p6 }
 0x238   : > { %p1852_p8 = pneg %p1851_p7 }
 0x23a   : > { %2003 = dma.done.wait (%p1852_p8), %s1543_s8, 2048  }
 0x23b   : > { %2005 = vsyncadd (%p1852_p8), %s1543_s8, 4294965248  ;;  %p14_p9 = scmp.ge.s32.totalorder %s2076_s21, 4   ;;  %s2923_s15 = smov %s2012_s16 }
 0x23c   : > { %s2924_s16 = smov %s2016_s17  ;;  %s2925_s17 = smov %s2087_s24 }
 0x23d   : > { %s2926_s18 = smov %s2076_s21  ;;  %16 = sbr.rel (!%p14_p9) target bundleno = 3 (0x3), region = 75 }
 0x242   :  { %1549 = vsyncpa [#allocation3], 1 }
 0x243   :  { %1551 = vsyncpa [#allocation3 + $0x1], 1 }

</bundles_post_ra>
